<compile_context>
chip_gen: v6e
topology: v6e:2x2x1
jax: 0.10.0
libtpu: 0.0.40
codegen_flags: <defaults>
</compile_context>

<pallas_src>
import functools

import jax
import jax.numpy as jnp
from jax import lax
from jax.experimental import pallas as pl
from jax.experimental.pallas import tpu as pltpu

BN_EPS = 1e-5


def _cam_kernel(x_ref, m_ref, w_ref, wb_ref, out_ref, acc_ref, *, C, block_j, num_slabs):
    """One batch element.

    x_ref  : (1, Ca, N) bf16  -- x augmented with a ones row (+ zero pad rows)
    m_ref  : (Ca, Ca)  bf16   -- theta_w^T @ phi_w with softmax-relevant bias folded in
    w_ref  : (C, C)    bf16   -- W conv weight with BatchNorm folded in
    wb_ref : (C, 1)    f32    -- W conv bias with BatchNorm folded in
    out_ref: (1, C, N) f32
    acc_ref: (C, N)    f32 scratch -- value @ normalized-attention accumulator
    """
    N = out_ref.shape[-1]

    acc_ref[...] = jnp.zeros_like(acc_ref)

    # logits = x_aug^T @ (M_aug @ x_aug); precompute MX = M_aug @ x_aug once, keep bf16 copy.
    mx = jnp.dot(m_ref[...], x_ref[0], preferred_element_type=jnp.float32)   # (Ca, N) f32
    mx_bf = mx.astype(jnp.bfloat16)

    ones_row = jnp.ones((1, N), jnp.bfloat16)

    def slab_body(s, carry):
        j0 = pl.multiple_of(s * block_j, block_j)
        x_slab = x_ref[0, :, pl.ds(j0, block_j)]                              # (Ca, TJ) bf16

        # logits_slab[j, i] = sum_a x_aug[a, j0+j] * MX[a, i]
        logits = lax.dot_general(x_slab, mx_bf, (((0,), (0,)), ((), ())),
                                 preferred_element_type=jnp.float32)          # (TJ, N) f32

        # Softmax numerator in f32 over the last axis.
        m = jnp.max(logits, axis=-1, keepdims=True)                           # (TJ, 1)
        e = jnp.exp(logits - m)                                               # (TJ, N) f32
        e_bf = e.astype(jnp.bfloat16)

        # Row sums of e laid out along lanes: rs[0, j] = sum_i e[j, i]  (small MXU op).
        rs = lax.dot_general(ones_row, e_bf, (((1,), (1,)), ((), ())),
                             preferred_element_type=jnp.float32)              # (1, TJ)
        inv = pl.reciprocal(rs, approx=True)                                  # (1, TJ)

        # Normalization folded into the VALUE operand (per contraction index j):
        # out[c, i] += sum_j x[c, j] * e[j, i] / rowsum[j]
        x_val = (x_slab[:C].astype(jnp.float32) * inv).astype(jnp.bfloat16)   # (C, TJ)

        acc_ref[...] += jnp.dot(x_val, e_bf, preferred_element_type=jnp.float32)  # (C, N)
        return carry

    lax.fori_loop(0, num_slabs, slab_body, None, unroll=num_slabs <= 8)

    # W 1x1 conv with folded BatchNorm, then residual (f32).
    y = jnp.dot(w_ref[...], acc_ref[...].astype(jnp.bfloat16),
                preferred_element_type=jnp.float32) + wb_ref[...]             # (C, N)
    out_ref[0] = (y + x_ref[0, :C, :].astype(jnp.float32)).astype(out_ref.dtype)


def channel_attention_pallas(x, params, *, block_j=128):
    B, C, H, W = x.shape
    N = H * W
    if C % 8 != 0 or C < 8:
        raise ValueError("in_channels must be a multiple of 8 (inter_channels = C // 8)")
    if N % 128 != 0:
        # TODO(synk): arbitrary H*W needs lane padding / masked stores; not implemented.
        raise ValueError("H*W must be a multiple of 128")
    tj = min(block_j, N)
    assert N % tj == 0
    num_slabs = N // tj

    f32 = jnp.float32
    x_flat = x.reshape(B, C, N).astype(f32)

    # ---- wrapper-side algebraic folding (tiny, done once per call) ----
    # (1) Inference BatchNorm folded into the W conv.
    bn_scale = params["bn_gamma"] / jnp.sqrt(params["bn_var"] + BN_EPS)
    bn_shift = params["bn_beta"] - params["bn_mean"] * bn_scale
    w_w = (bn_scale[:, None] * params["w_w"]).astype(jnp.bfloat16)            # (C, C)
    w_b = (bn_scale * params["w_b"] + bn_shift).astype(f32).reshape(C, 1)     # (C, 1)

    # (2) theta/phi convs + theta^T @ phi collapsed to one matrix; logits = x_aug^T M_aug x_aug.
    #     Only the bias term that varies along the softmax axis survives (others cancel).
    M = params["theta_w"].T @ params["phi_w"]                                 # (C, C)
    v = params["theta_b"] @ params["phi_w"]                                   # (C,)
    Ca = ((C + 1 + 7) // 8) * 8
    M_aug = (jnp.zeros((Ca, Ca), f32)
             .at[:C, :C].set(M)
             .at[C, :C].set(v)).astype(jnp.bfloat16)

    ones_row = jnp.ones((B, 1, N), f32)
    pad = jnp.zeros((B, Ca - C - 1, N), f32)
    x_aug = jnp.concatenate([x_flat, ones_row, pad], axis=1).astype(jnp.bfloat16)  # (B, Ca, N)

    kernel = functools.partial(_cam_kernel, C=C, block_j=tj, num_slabs=num_slabs)

    out_flat = pl.pallas_call(
        kernel,
        out_shape=jax.ShapeDtypeStruct((B, C, N), f32),
        grid_spec=pltpu.PrefetchScalarGridSpec(
            num_scalar_prefetch=0,
            grid=(B,),
            in_specs=[
                pl.BlockSpec((1, Ca, N), lambda b: (b, 0, 0)),   # x_aug (bf16)
                pl.BlockSpec((Ca, Ca), lambda b: (0, 0)),        # M_aug (bf16)
                pl.BlockSpec((C, C), lambda b: (0, 0)),          # W weight (bf16, BN folded)
                pl.BlockSpec((C, 1), lambda b: (0, 0)),          # W bias (f32, BN folded)
            ],
            out_specs=pl.BlockSpec((1, C, N), lambda b: (b, 0, 0)),
            scratch_shapes=[pltpu.VMEM((C, N), f32)],
        ),
        compiler_params=pltpu.CompilerParams(
            dimension_semantics=("parallel",),
            vmem_limit_bytes=64 * 1024 * 1024,
        ),
    )(x_aug, M_aug, w_w, w_b)

    return out_flat.reshape(B, C, H, W)


def init_params(key, in_channels):
    inter = in_channels // 8
    k1, k2, k3, k4, k5, k6 = jax.random.split(key, 6)

    def conv_w(k, out_c, in_c):
        bound = 1.0 / (in_c ** 0.5)
        return jax.random.uniform(k, (out_c, in_c), jnp.float32, -bound, bound)

    def conv_b(k, out_c, in_c):
        bound = 1.0 / (in_c ** 0.5)
        return jax.random.uniform(k, (out_c,), jnp.float32, -bound, bound)

    return {
        "theta_w": conv_w(k1, inter, in_channels),
        "theta_b": conv_b(k2, inter, in_channels),
        "phi_w": conv_w(k3, inter, in_channels),
        "phi_b": conv_b(k4, inter, in_channels),
        "w_w": conv_w(k5, in_channels, in_channels),
        "w_b": conv_b(k6, in_channels, in_channels),
        "bn_gamma": jnp.ones((in_channels,), jnp.float32),
        "bn_beta": jnp.zeros((in_channels,), jnp.float32),
        "bn_mean": jnp.zeros((in_channels,), jnp.float32),
        "bn_var": jnp.ones((in_channels,), jnp.float32),
    }


def channel_attention_reference(x, params):
    """Pure-JAX f32 reference for correctness checking."""
    B, C, H, W = x.shape
    N = H * W
    xf = x.reshape(B, C, N).astype(jnp.float32)
    theta = jnp.einsum("oc,bcn->bon", params["theta_w"], xf) + params["theta_b"][None, :, None]
    phi = jnp.einsum("oc,bcn->bon", params["phi_w"], xf) + params["phi_b"][None, :, None]
    logits = jnp.einsum("bki,bkj->bij", theta, phi)
    m = jnp.max(logits, axis=-1, keepdims=True)
    e = jnp.exp(logits - m)
    att = e / jnp.sum(e, axis=-1, keepdims=True)
    out_att = jnp.einsum("bcj,bji->bci", xf, att)
    y = jnp.einsum("oc,bcn->bon", params["w_w"], out_att) + params["w_b"][None, :, None]
    scale = params["bn_gamma"] / jnp.sqrt(params["bn_var"] + BN_EPS)
    shift = params["bn_beta"] - params["bn_mean"] * scale
    y = y * scale[None, :, None] + shift[None, :, None]
    return (y + xf).reshape(B, C, H, W)


if __name__ == "__main__":
    B, C, H, W = 2, 64, 16, 16   # C multiple of 8 (inter = C//8); H*W multiple of 128
    key = jax.random.PRNGKey(0)
    kx, kp = jax.random.split(key)
    x = jax.random.normal(kx, (B, C, H, W), jnp.float32)
    params = init_params(kp, C)

    out = channel_attention_pallas(x, params)   # N=256, block_j=128 -> 2 slabs per batch
    out = jax.block_until_ready(out)

    ref = channel_attention_reference(x, params)
    assert out.shape == (B, C, H, W)
    # bf16 MXU inputs + approx reciprocal => looser tolerance than a pure-f32 kernel.
    err = float(jnp.max(jnp.abs(out - ref)))
    assert jnp.allclose(out, ref, atol=5e-2, rtol=5e-2), f"mismatch vs reference, max abs diff {err}"
    print("KERNEL_OK")
</pallas_src>

<mosaic_0001>
module attributes {stable_mosaic.version = 11 : i64} {
  func.func @_cam_kernel(%arg0: i32, %arg1: memref<1x72x256xbf16, #tpu.memory_space<vmem>>, %arg2: memref<72x72xbf16, #tpu.memory_space<vmem>>, %arg3: memref<64x64xbf16, #tpu.memory_space<vmem>>, %arg4: memref<64x1xf32, #tpu.memory_space<vmem>>, %arg5: memref<1x64x256xf32, #tpu.memory_space<vmem>>, %arg6: memref<64x256xf32, #tpu.memory_space<vmem>>) attributes {dimension_semantics = [#tpu.dimension_semantics<parallel>], iteration_bounds = array<i64: 2>, scalar_prefetch = 0 : i64, scratch_operands = 1 : i64, tpu.core_type = #tpu.core_type<tc>, window_params = [{transform_indices = @transform_0, window_bounds = array<i64: 1, 72, 256>}, {pipeline_mode = #tpu.pipeline_mode<synchronous>, transform_indices = @transform_1, window_bounds = array<i64: 72, 72>}, {pipeline_mode = #tpu.pipeline_mode<synchronous>, transform_indices = @transform_2, window_bounds = array<i64: 64, 64>}, {pipeline_mode = #tpu.pipeline_mode<synchronous>, transform_indices = @transform_3, window_bounds = array<i64: 64, 1>}, {transform_indices = @transform_4, window_bounds = array<i64: 1, 64, 256>}]} {
    %cst = arith.constant 0.000000e+00 : f32
    %0 = vector.broadcast %cst : f32 to vector<64x256xf32>
    %c0 = arith.constant 0 : index
    %c0_0 = arith.constant 0 : index
    %1 = vector.load %arg6[%c0, %c0_0] : memref<64x256xf32, #tpu.memory_space<vmem>>, vector<64x256xf32>
    tpu.vector_store %arg6[%c0, %c0_0], %0 {strides = array<i32>} : memref<64x256xf32, #tpu.memory_space<vmem>>, vector<64x256xf32>,
    %c0_1 = arith.constant 0 : index
    %c0_2 = arith.constant 0 : index
    %2 = vector.load %arg2[%c0_1, %c0_2] : memref<72x72xbf16, #tpu.memory_space<vmem>>, vector<72x72xbf16>
    %c0_3 = arith.constant 0 : index
    %c0_4 = arith.constant 0 : index
    %c0_5 = arith.constant 0 : index
    %3 = vector.load %arg1[%c0_3, %c0_4, %c0_5] : memref<1x72x256xbf16, #tpu.memory_space<vmem>>, vector<1x72x256xbf16>
    %4 = vector.shape_cast %3 : vector<1x72x256xbf16> to vector<72x256xbf16>
    %cst_6 = arith.constant dense<0.000000e+00> : vector<72x256xf32>
    %5 = tpu.matmul %2, %4, %cst_6 {dimension_numbers = #tpu.dot_dimension_numbers<[1], [0], [0], [1], [0, 0, 1, 1], [], []>} : vector<72x72xbf16>, vector<72x256xbf16>, vector<72x256xf32> -> vector<72x256xf32>
    %6 = arith.truncf %5 : vector<72x256xf32> to vector<72x256xbf16>
    %cst_7 = arith.constant 1.000000e+00 : bf16
    %7 = vector.broadcast %cst_7 : bf16 to vector<1x256xbf16>
    %c0_i32 = arith.constant 0 : i32
    %c128_i32 = arith.constant 128 : i32
    %8 = arith.muli %c0_i32, %c128_i32 : i32
    %9 = tpu.assume_multiple %8, 128 : i32
    %c0_8 = arith.constant 0 : index
    %c0_9 = arith.constant 0 : index
    %10 = arith.index_cast %9 : i32 to index
    %11 = vector.load %arg1[%c0_8, %c0_9, %10] : memref<1x72x256xbf16, #tpu.memory_space<vmem>>, vector<1x72x128xbf16>
    %12 = vector.shape_cast %11 : vector<1x72x128xbf16> to vector<72x128xbf16>
    %cst_10 = arith.constant dense<0.000000e+00> : vector<128x256xf32>
    %13 = tpu.matmul %12, %6, %cst_10 {dimension_numbers = #tpu.dot_dimension_numbers<[0], [0], [1], [1], [0, 1, 1, 1], [], []>} : vector<72x128xbf16>, vector<72x256xbf16>, vector<128x256xf32> -> vector<128x256xf32>
    %cst_11 = arith.constant dense<0xFF800000> : vector<128xf32>
    %14 = vector.multi_reduction <maximumf>, %13, %cst_11 [1] : vector<128x256xf32> to vector<128xf32>
    %15 = vector.shape_cast %14 : vector<128xf32> to vector<128x1xf32>
    %16 = vector.broadcast %15 : vector<128x1xf32> to vector<128x256xf32>
    %17 = arith.subf %13, %16 : vector<128x256xf32>
    %18 = math.exp %17 : vector<128x256xf32>
    %19 = arith.truncf %18 : vector<128x256xf32> to vector<128x256xbf16>
    %cst_12 = arith.constant dense<0.000000e+00> : vector<1x128xf32>
    %20 = tpu.matmul %7, %19, %cst_12 {dimension_numbers = #tpu.dot_dimension_numbers<[1], [1], [0], [0], [0, 0, 1, 0], [], []>} : vector<1x256xbf16>, vector<128x256xbf16>, vector<1x128xf32> -> vector<1x128xf32>
    %21 = tpu.reciprocal %20 {approx = true} : vector<1x128xf32> -> vector<1x128xf32>
    %22 = vector.extract_strided_slice %12 {offsets = [0, 0], sizes = [64, 128], strides = [1, 1]} : vector<72x128xbf16> to vector<64x128xbf16>
    %23 = arith.extf %22 : vector<64x128xbf16> to vector<64x128xf32>
    %24 = vector.broadcast %21 : vector<1x128xf32> to vector<64x128xf32>
    %25 = arith.mulf %23, %24 : vector<64x128xf32>
    %26 = arith.truncf %25 : vector<64x128xf32> to vector<64x128xbf16>
    %c0_13 = arith.constant 0 : index
    %c0_14 = arith.constant 0 : index
    %27 = vector.load %arg6[%c0_13, %c0_14] : memref<64x256xf32, #tpu.memory_space<vmem>>, vector<64x256xf32>
    %cst_15 = arith.constant dense<0.000000e+00> : vector<64x256xf32>
    %28 = tpu.matmul %26, %19, %cst_15 {dimension_numbers = #tpu.dot_dimension_numbers<[1], [0], [0], [1], [0, 0, 1, 1], [], []>} : vector<64x128xbf16>, vector<128x256xbf16>, vector<64x256xf32> -> vector<64x256xf32>
    %29 = arith.addf %27, %28 : vector<64x256xf32>
    %c0_16 = arith.constant 0 : index
    %c0_17 = arith.constant 0 : index
    %30 = vector.load %arg6[%c0_16, %c0_17] : memref<64x256xf32, #tpu.memory_space<vmem>>, vector<64x256xf32>
    tpu.vector_store %arg6[%c0_16, %c0_17], %29 {strides = array<i32>} : memref<64x256xf32, #tpu.memory_space<vmem>>, vector<64x256xf32>,
    %c1_i32 = arith.constant 1 : i32
    %c128_i32_18 = arith.constant 128 : i32
    %31 = arith.muli %c1_i32, %c128_i32_18 : i32
    %32 = tpu.assume_multiple %31, 128 : i32
    %c0_19 = arith.constant 0 : index
    %c0_20 = arith.constant 0 : index
    %33 = arith.index_cast %32 : i32 to index
    %34 = vector.load %arg1[%c0_19, %c0_20, %33] : memref<1x72x256xbf16, #tpu.memory_space<vmem>>, vector<1x72x128xbf16>
    %35 = vector.shape_cast %34 : vector<1x72x128xbf16> to vector<72x128xbf16>
    %cst_21 = arith.constant dense<0.000000e+00> : vector<128x256xf32>
    %36 = tpu.matmul %35, %6, %cst_21 {dimension_numbers = #tpu.dot_dimension_numbers<[0], [0], [1], [1], [0, 1, 1, 1], [], []>} : vector<72x128xbf16>, vector<72x256xbf16>, vector<128x256xf32> -> vector<128x256xf32>
    %cst_22 = arith.constant dense<0xFF800000> : vector<128xf32>
    %37 = vector.multi_reduction <maximumf>, %36, %cst_22 [1] : vector<128x256xf32> to vector<128xf32>
    %38 = vector.shape_cast %37 : vector<128xf32> to vector<128x1xf32>
    %39 = vector.broadcast %38 : vector<128x1xf32> to vector<128x256xf32>
    %40 = arith.subf %36, %39 : vector<128x256xf32>
    %41 = math.exp %40 : vector<128x256xf32>
    %42 = arith.truncf %41 : vector<128x256xf32> to vector<128x256xbf16>
    %cst_23 = arith.constant dense<0.000000e+00> : vector<1x128xf32>
    %43 = tpu.matmul %7, %42, %cst_23 {dimension_numbers = #tpu.dot_dimension_numbers<[1], [1], [0], [0], [0, 0, 1, 0], [], []>} : vector<1x256xbf16>, vector<128x256xbf16>, vector<1x128xf32> -> vector<1x128xf32>
    %44 = tpu.reciprocal %43 {approx = true} : vector<1x128xf32> -> vector<1x128xf32>
    %45 = vector.extract_strided_slice %35 {offsets = [0, 0], sizes = [64, 128], strides = [1, 1]} : vector<72x128xbf16> to vector<64x128xbf16>
    %46 = arith.extf %45 : vector<64x128xbf16> to vector<64x128xf32>
    %47 = vector.broadcast %44 : vector<1x128xf32> to vector<64x128xf32>
    %48 = arith.mulf %46, %47 : vector<64x128xf32>
    %49 = arith.truncf %48 : vector<64x128xf32> to vector<64x128xbf16>
    %c0_24 = arith.constant 0 : index
    %c0_25 = arith.constant 0 : index
    %50 = vector.load %arg6[%c0_24, %c0_25] : memref<64x256xf32, #tpu.memory_space<vmem>>, vector<64x256xf32>
    %cst_26 = arith.constant dense<0.000000e+00> : vector<64x256xf32>
    %51 = tpu.matmul %49, %42, %cst_26 {dimension_numbers = #tpu.dot_dimension_numbers<[1], [0], [0], [1], [0, 0, 1, 1], [], []>} : vector<64x128xbf16>, vector<128x256xbf16>, vector<64x256xf32> -> vector<64x256xf32>
    %52 = arith.addf %50, %51 : vector<64x256xf32>
    %c0_27 = arith.constant 0 : index
    %c0_28 = arith.constant 0 : index
    %53 = vector.load %arg6[%c0_27, %c0_28] : memref<64x256xf32, #tpu.memory_space<vmem>>, vector<64x256xf32>
    tpu.vector_store %arg6[%c0_27, %c0_28], %52 {strides = array<i32>} : memref<64x256xf32, #tpu.memory_space<vmem>>, vector<64x256xf32>,
    %c2_i32 = arith.constant 2 : i32
    %c0_29 = arith.constant 0 : index
    %c0_30 = arith.constant 0 : index
    %54 = vector.load %arg3[%c0_29, %c0_30] : memref<64x64xbf16, #tpu.memory_space<vmem>>, vector<64x64xbf16>
    %c0_31 = arith.constant 0 : index
    %c0_32 = arith.constant 0 : index
    %55 = vector.load %arg6[%c0_31, %c0_32] : memref<64x256xf32, #tpu.memory_space<vmem>>, vector<64x256xf32>
    %56 = arith.truncf %55 : vector<64x256xf32> to vector<64x256xbf16>
    %cst_33 = arith.constant dense<0.000000e+00> : vector<64x256xf32>
    %57 = tpu.matmul %54, %56, %cst_33 {dimension_numbers = #tpu.dot_dimension_numbers<[1], [0], [0], [1], [0, 0, 1, 1], [], []>} : vector<64x64xbf16>, vector<64x256xbf16>, vector<64x256xf32> -> vector<64x256xf32>
    %c0_34 = arith.constant 0 : index
    %c0_35 = arith.constant 0 : index
    %58 = vector.load %arg4[%c0_34, %c0_35] : memref<64x1xf32, #tpu.memory_space<vmem>>, vector<64x1xf32>
    %59 = vector.broadcast %58 : vector<64x1xf32> to vector<64x256xf32>
    %60 = arith.addf %57, %59 : vector<64x256xf32>
    %c0_36 = arith.constant 0 : index
    %c0_37 = arith.constant 0 : index
    %c0_38 = arith.constant 0 : index
    %61 = vector.load %arg1[%c0_36, %c0_37, %c0_38] : memref<1x72x256xbf16, #tpu.memory_space<vmem>>, vector<1x64x256xbf16>
    %62 = vector.shape_cast %61 : vector<1x64x256xbf16> to vector<64x256xbf16>
    %63 = arith.extf %62 : vector<64x256xbf16> to vector<64x256xf32>
    %64 = arith.addf %60, %63 : vector<64x256xf32>
    %c0_39 = arith.constant 0 : index
    %c0_40 = arith.constant 0 : index
    %c0_41 = arith.constant 0 : index
    %65 = vector.load %arg5[%c0_39, %c0_40, %c0_41] : memref<1x64x256xf32, #tpu.memory_space<vmem>>, vector<1x64x256xf32>
    %66 = vector.shape_cast %65 : vector<1x64x256xf32> to vector<64x256xf32>
    %67 = vector.shape_cast %64 : vector<64x256xf32> to vector<1x64x256xf32>
    tpu.vector_store %arg5[%c0_39, %c0_40, %c0_41], %67 {strides = array<i32>} : memref<1x64x256xf32, #tpu.memory_space<vmem>>, vector<1x64x256xf32>,
    return
  }
  func.func @transform_0(%arg0: i32) -> (i32, i32, i32) {
    %c0_i32 = arith.constant 0 : i32
    %c0_i32_0 = arith.constant 0 : i32
    %c0_i32_1 = arith.constant 0 : i32
    return %arg0, %c0_i32, %c0_i32_0 : i32, i32, i32
  }
  func.func @transform_1(%arg0: i32) -> (i32, i32) {
    %c0_i32 = arith.constant 0 : i32
    %c0_i32_0 = arith.constant 0 : i32
    %c0_i32_1 = arith.constant 0 : i32
    return %c0_i32, %c0_i32_0 : i32, i32
  }
  func.func @transform_2(%arg0: i32) -> (i32, i32) {
    %c0_i32 = arith.constant 0 : i32
    %c0_i32_0 = arith.constant 0 : i32
    %c0_i32_1 = arith.constant 0 : i32
    return %c0_i32, %c0_i32_0 : i32, i32
  }
  func.func @transform_3(%arg0: i32) -> (i32, i32) {
    %c0_i32 = arith.constant 0 : i32
    %c0_i32_0 = arith.constant 0 : i32
    %c0_i32_1 = arith.constant 0 : i32
    return %c0_i32, %c0_i32_0 : i32, i32
  }
  func.func @transform_4(%arg0: i32) -> (i32, i32, i32) {
    %c0_i32 = arith.constant 0 : i32
    %c0_i32_0 = arith.constant 0 : i32
    %c0_i32_1 = arith.constant 0 : i32
    return %arg0, %c0_i32, %c0_i32_0 : i32, i32, i32
  }
}

</mosaic_0001>

<bundles_post_ra>
// kernel: tpu_custom_call.1
= control target key start
LH: loop header
LB: loop body
LE: loop exit
PB: predicated region body
PF: predicated region fallthrough
CT: control target
= control target key end

     0   :  { %9 = vsyncpa [#allocation4], 0  ;;  %s2941_s0 = inlined_call_operand.hbm [shape: bf16[2,72,256], index: 0, kind: input, shape index: {}]   ;;  %s2942_s1 = inlined_call_operand.vmem [shape: bf16[72,72], index: 1, kind: input, shape index: {}]   ;;  %s2943_s2 = inlined_call_operand.vmem [shape: bf16[64,64], index: 2, kind: input, shape index: {}]   ;;  %s2944_s3 = inlined_call_operand.vmem [shape: f32[64,1], index: 3, kind: input, shape index: {}]   ;;  %s2945_s4 = inlined_call_operand.hbm [shape: f32[2,64,256], index: 4, kind: output, shape index: {}]  }
   0x1   :  { %11 = vsyncpa [#allocation4 + $0x1], 0 }
   0x2   :  { %12 = vsyncpa [#allocation5], 0 }
   0x3   :  { %14 = vsyncpa [#allocation5 + $0x1], 0  ;;  %s2277_s15 = smov 0   ;;  %s2279_s16 = smov 0  }
   0x4   :  { %s2281_s17 = smov 0   ;;  %s2283_s18 = smov 0  }
   0x5 LB: > { %s2298_s19 = sadd.s32 4294967295, %s2242_s18   ;;  %s1842_s20 = sadd.s32 4294967294, %s2242_s18   ;;  %s2242_s18 = sphi %s2283_s18, %s2974_s18   ;;  %s2238_s17 = sphi %s2281_s17, %s2973_s17   ;;  %s2234_s16 = sphi %s2279_s16, %s2972_s16   ;;  %s2230_s15 = sphi %s2277_s15, %s2971_s15  }
   0x6   : > { %s2302_s21 = sadd.s32 1, %s2242_s18   ;;  %s27_s22 = sadd.s32 1, %s2238_s17 }
   0x7   : > { %s24_s23 = ssub.s32 %s2242_s18, %s2302_s21  ;;  %p34_p0 = scmp.ne.s32.totalorder %s2238_s17, %s2234_s16 }
   0x8   : > { %p25_p1 = scmp.eq.s32.totalorder %s24_s23, 0  ;;  %p35_p2 = scmp.eq.s32.totalorder %s2242_s18, 0 }
   0x9   : > { %p40_p3 = scmp.ne.s32.totalorder %s2234_s16, %s2230_s15  ;;  %p41_p4 = scmp.eq.s32.totalorder %s2298_s19, 0 }
   0xa   : > { %s2314_s24 = scalar_select %p25_p1, %s2238_s17, %s27_s22  }
   0xb   : > { %p36_p5 = por %p35_p2, %p34_p0  ;;  %p2316_p6 = por %p41_p4, %p40_p3 }
   0xc   : > { %p127_p7 = scmp.eq.s32.totalorder %s2298_s19, 1  ;;  %p133_p8 = scmp.eq.s32.totalorder %s1842_s20, 1 }
   0xd   : > { %s2954_s25 = scalar_select %p2316_p6, 1, 0 }
   0xe   : > { %p1935_p10 = scmp.lt.s32.totalorder %s2242_s18, 2  ;;  %p2323_p11 = por %p127_p7, %p34_p0 }
   0xf   : > { %p2327_p12 = por %p133_p8, %p40_p3  ;;  %s162_s28 = sand.u32 1, %s2238_s17  }
  0x10   : > { %s2955_s26 = scalar_select %p2323_p11, 1, 0 }
  0x11   : > { %s2956_s27 = scalar_select %p2327_p12, 1, 0 }
  0x12   : > { %s1921_s29 = smul.u32 1152, %s2242_s18  ;;  %p2338_p13 = pnand %p1935_p10, %p36_p5 }
  0x13   : > { %s1920_s30 = smul.u32 72, %s162_s28  ;;  %s2344_s11 = scalar_lea.sflag [#allocation4], %s162_s28 }
  0x14   : > { %s2336_s7 = scalar_lea.hbm %s2941_s0, %s1921_s29  ;;  %p2152_p1 = pneg %p2338_p13 }
  0x15   : > { %s166_s9 = scalar_lea.vmem [#allocation3], %s1920_s30  ;;  %s2150_s12 = scalar_lea.hbm %s2336_s7, 1152 }
  0x16   : > { %s173_s10 = sshll.u32 %s166_s9, 4  ;;  %p2151_p0 = scmp.ne.s32.totalorder %s2336_s7, %s2150_s12  ;;  %s2342_s10 = int_to_ptr.vmem [resolvable:$true] %s173_s10 }
  0x17   : > { %s2155_s20 = scalar_lea.hbm %s2941_s0, 2304  ;;  %p2156_p4 = scmp.lt.s32.totalorder %s2336_s7, %s2941_s0 }
  0x18   : > { %p2153_p2 = pnand %p2152_p1, %p2151_p0  ;;  %p2157_p5 = scmp.lt.s32.totalorder %s2155_s20, %s2150_s12 }
  0x1a   : > { %p2154_p3 = pneg %p2153_p2  ;;  %p2158_p7 = por %p2157_p5, %p2156_p4 }
  0x1c   : > { %p2159_p8 = pnand %p2158_p7, %p2154_p3 }
  0x1e   : > { %2162 = shalt.err (!%p2159_p8)
}
  0x1f   : > { %s2163_s28 = scalar_lea.vmem %s2342_s10, 1152  ;;  %s2244_s29 = smov [#allocation3]  }
  0x20   : > { %p2164_p10 = scmp.ne.s32.totalorder %s2342_s10, %s2163_s28  ;;  %s2168_s30 = sshll.u32 %s2244_s29, 4  ;;  %s2169_s30 = int_to_ptr.vmem [resolvable:$false] %s2168_s30 }
  0x21   : > { %s2170_s5 = scalar_lea.vmem %s2169_s30, 2304  ;;  %p2171_p2 = scmp.lt.s32.totalorder %s2342_s10, %s2169_s30 }
  0x22   : > { %p2166_p9 = pnand %p2164_p10, %p2152_p1  ;;  %p2172_p12 = scmp.lt.s32.totalorder %s2170_s5, %s2163_s28 }
  0x24   : > { %p2167_p0 = pneg %p2166_p9  ;;  %p2173_p11 = por %p2172_p12, %p2171_p2 }
  0x26   : > { %p2174_p6 = pnand %p2173_p11, %p2167_p0 }
  0x28   : > { %2177 = shalt.err (!%p2174_p6)
}
  0x29   : > { %s2245_s6 = smov 128   ;;  %s2246_s9 = smov 8  }
  0x2a   : > { %1930 = dma.hbm_to_vmem [thread:$0]  (!%p2338_p13), %s2336_s7, 1152, %s2342_s10, %s2344_s11, %s2245_s6, %s2245_s6, %s2246_s9  }
  0x2b   : > { %p1846_p9 = scmp.ge.s32.totalorder %s2242_s18, 1  ;;  %p181_p1 = scmp.lt.s32.totalorder %s2242_s18, 3 }
  0x2d   : > { %p182_p3 = pnand %p1846_p9, %p181_p1 }
  0x2f   : > { %185 = sbr.rel (%p182_p3) target bundleno = 2006 (0x7d6), region = 36 }
  0x34   : > { %s2368_s12 = sand.u32 1, %s2234_s16   ;;  %p2958_p6 = scmp.ne.s32.totalorder %s2954_s25, 0 }
  0x35   : > { %s1922_s13 = smul.u32 72, %s2368_s12  ;;  %s188_s14 = scalar_lea.sflag [#allocation4], %s2368_s12 }
  0x37   : > { %s2372_s20 = scalar_lea.vmem [#allocation3], %s1922_s13 }
  0x38   : > { %2221 = dma.done.wait (%p2958_p6), %s188_s14, 1152  }
  0x39   : > { %2223 = vsyncadd (%p2958_p6), %s188_s14, 4294966144  ;;  %v2948_v0 = vmov 0   ;;  %v251_v1 = vld [vmem:[%s2372_s20 + $0x40] sm:$0xff]  ;;  %vm336_vm0 = vcmask 1043456   ;;  %v1979_v4 = vld [vmem:[%s2372_s20 + $0x34] ss:$8 sps:$4 sm:$0xff]  }
  0x3a   : > { %375 = vmatprep.mubr.bf16.mxu0 %v2948_v0  ;;  %549 = vmatprep.mubr.bf16.mxu1 %v2948_v0  ;;  %v1862_v2 = vcombine.high %v251_v1, %v251_v1  ;;  %v1861_v3 = vcombine.low %v251_v1, %v251_v1  ;;  %v1981_v6 = vld [vmem:[%s2372_s20 + $0x30] ss:$8 sps:$4 sm:$0xff]   ;;  %v1982_v7 = vld [vmem:[%s2372_s20 + $0x24] ss:$8 sps:$4 sm:$0xff]   ;;  %v1984_v8 = vld [vmem:[%s2372_s20 + $0x20] ss:$8 sps:$4 sm:$0xff]  }
  0x3b   : > { %v1985_v9 = vld [vmem:[%s2372_s20 + $0x14] ss:$8 sps:$4 sm:$0xff]   ;;  %v2389_v10 = vld [vmem:[%s2372_s20] sm:$0xf]  ;;  %v2392_v11 = vld [vmem:[%s2372_s20 + $0x8] sm:$0xf] }
  0x3c   : > { %1863 = vmatprep.subr.msk.bf16.mxu0 %vm336_vm0, %v1862_v2  ;;  %v338_v5 = vsel %vm336_vm0, %v1861_v3, 0  ;;  %v1869_v12 = vcombine.low %v2389_v10, %v2392_v11  ;;  %v2397_v13 = vld [vmem:[%s2372_s20 + $0x10] sm:$0xf]  ;;  %v2400_v14 = vld [vmem:[%s2372_s20 + $0x18] sm:$0xf]  ;;  %vm320_vm1 = vcmask 588800  }
  0x3d   : > { %350 = vmatpush1.bf16.msra.mxu0 %v338_v5  ;;  %v1987_v15 = vld [vmem:[%s2372_s20 + $0x10] ss:$8 sps:$4 sm:$0xff]   ;;  %v1988_v16 = vld [vmem:[%s2372_s20 + $0x4] ss:$8 sps:$4 sm:$0xff]   ;;  %v2405_v17 = vld [vmem:[%s2372_s20 + $0x20] sm:$0xf]  ;;  %v1870_v18 = vcombine.low %v2397_v13, %v2400_v14 }
  0x3e   : > { %351 = vmatprep.subr.bf16.mxu0 %v1979_v4  ;;  %2959 = vst [vmem:[#allocation9_spill] sm:$0xff] %v2405_v17  ;;  %471 = vxpose.xlu0.c.b16.start [1/5] (short) %v1869_v12, 128  ;;  %v2410_v19 = vld [vmem:[%s2372_s20 + $0x28] sm:$0xf]  ;;  %v2416_v22 = vld [vmem:[%s2372_s20 + $0x30] sm:$0xf]  ;;  %v1991_v24 = vld [vmem:[%s2942_s1] sm:$0xff]  }
  0x3f   : > { %2960 = vst [vmem:[#allocation10_spill] sm:$0xff] %v2410_v19  ;;  %v1990_v20 = vld [vmem:[%s2372_s20] ss:$8 sps:$4 sm:$0xff]   ;;  %v1871_v21 = vcombine.low %v2405_v17, %v2410_v19  ;;  %2961 = vst [vmem:[#allocation11_spill] sm:$0xff] %v2416_v22  ;;  %v2419_v23 = vld [vmem:[%s2372_s20 + $0x38] sm:$0xf] }
  0x40   : > { %2962 = vst [vmem:[#allocation12_spill] sm:$0xff] %v2419_v23  ;;  %v1872_v25 = vcombine.low %v2416_v22, %v2419_v23  ;;  %v2000_v26 = vld [vmem:[%s2372_s20 + $0x40] ss:$0 sps:$4 sm:$0xff]   ;;  %v1993_v28 = vld [vmem:[%s2942_s1 + $0x10] sm:$0xff]   ;;  %v1994_v29 = vld [vmem:[%s2942_s1 + $0x18] sm:$0xff]   ;;  %vm1613_vm2 = vcmask 523264  }
  0x41   : > { %352 = vmatpush1.bf16.msra.mxu0 %v1981_v6  ;;  %v1992_v27 = vld [vmem:[%s2942_s1 + $0x8] sm:$0xff]   ;;  %v1995_v30 = vld [vmem:[%s2942_s1 + $0x20] ss:$0 sps:$4 sm:$0xff]   ;;  %s1847_s11 = sshll.u32 %s2368_s12, 7  ;;  %s1756_s5 = scalar_lea.sflag [#allocation5], %s2368_s12 }
  0x42   : > { %353 = vmatprep.subr.bf16.mxu0 %v1982_v7  ;;  %472 = vxpose.xlu0.c.b16.cont [2/5] (short) %v1870_v18, 128  ;;  %s2868_s22 = scalar_lea.vmem [#allocation6], %s1847_s11  ;;  %p2968_p12 = scmp.ne.s32.totalorder %s2955_s26, 0 }
  0x43   : > { %s1769_s23 = sshll.u32 %s2868_s22, 4  ;;  %s2249_s6 = smov [#allocation6]   ;;  %s2896_s23 = int_to_ptr.vmem [resolvable:$true] %s1769_s23 }
  0x44   : > { %s2182_s9 = sshll.u32 %s2249_s6, 4  ;;  %s2183_s9 = int_to_ptr.vmem [resolvable:$false] %s2182_s9 }
  0x45   : > { %354 = vmatpush1.bf16.msra.mxu0 %v1984_v8  ;;  %s2184_s13 = scalar_lea.vmem %s2183_s9, 4096  ;;  %p2185_p5 = scmp.lt.s32.totalorder %s2896_s23, %s2183_s9 }
  0x46   : > { %355 = vmatprep.subr.bf16.mxu0 %v1985_v9  ;;  %473 = vxpose.xlu0.c.b16.cont [3/5] (short) %v1871_v21, 128 }
  0x49   : > { %356 = vmatpush1.bf16.msra.mxu0 %v1987_v15 }
  0x4a   : > { %357 = vmatprep.subr.bf16.mxu0 %v1988_v16  ;;  %474 = vxpose.xlu0.c.b16.cont [4/5] (short) %v1872_v25, 128 }
  0x4d   : > { %358 = vmatpush1.bf16.msra.mxu0 %v1990_v20 }
  0x4e   : > { %475 = vxpose.xlu0.c.b16.end [5/5] (short) %v2000_v26, 128 }
  0x50   : > { %1864 = vmatmul.mubr.msk.bf16.vlgmr.msra.gmra.mxu0 %vm320_vm1, %v1991_v24 }
  0x51   : > { %385 = vmatprep.mubr.bf16.mxu0 %v2948_v0 }
  0x57   : > { %1976 = vset.pattern.permute.xlu0 %v2948_v0 }
  0x58   : > { %1865 = vmatmul.mubr.msk.bf16.gmra.mxu0 %vm320_vm1, %v1992_v27 }
  0x59   : > { %395 = vmatprep.mubr.bf16.mxu0 %v2948_v0 }
  0x60   : > { %1866 = vmatmul.mubr.msk.bf16.gmra.mxu0 %vm320_vm1, %v1993_v28 }
  0x61   : > { %405 = vmatprep.mubr.bf16.mxu0 %v2948_v0 }
  0x68   : > { %1867 = vmatmul.mubr.msk.bf16.gmra.mxu0 %vm320_vm1, %v1994_v29 }
  0x69   : > { %415 = vmatprep.mubr.bf16.mxu0 %v2948_v0 }
  0x70   : > { %1868 = vmatmul.mubr.msk.bf16.gmra.mxu0 %vm320_vm1, %v1995_v30 }
  0xa0   : > { %v479_v62 = vpop.trf.xlu0 }
  0xa4   : > { %v480_v63 = vpop.trf.xlu0 }
  0xa8   : > { %v481_v1 = vpop.trf.xlu0 }
  0xac   : > { %v482_v2 = vpop.trf.xlu0 }
  0xb0   : > { %v483_v3 = vpop.trf.xlu0 }
  0xb4   : > { %v484_v4 = vpop.trf.xlu0 }
  0xb8   : > { %v485_v5 = vpop.trf.xlu0 }
  0xbc   : > { %v486_v6 = vpop.trf.xlu0 }
 0x110   : > { %v377_v31 = vpop.f32.mrf.mxu0 }
 0x112   : > { %v379_v32 = vpop.f32.mrf.mxu0 }
 0x114   : > { %v381_v33 = vpop.f32.mrf.mxu0 }
 0x115   : > { %v2478_v61 = vpack.c.bf16 %v381_v33, %v377_v31 }
 0x116   : > { %v383_v34 = vpop.f32.mrf.mxu0 }
 0x117   : > { %v2474_v60 = vpack.c.bf16 %v383_v34, %v379_v32 }
 0x118   : > { %v387_v35 = vpop.f32.mrf.mxu0 }
 0x11a   : > { %v389_v36 = vpop.f32.mrf.mxu0 }
 0x11c   : > { %v391_v37 = vpop.f32.mrf.mxu0 }
 0x11d   : > { %v2472_v59 = vpack.c.bf16 %v391_v37, %v387_v35 }
 0x11e   : > { %v393_v38 = vpop.f32.mrf.mxu0 }
 0x11f   : > { %v2468_v58 = vpack.c.bf16 %v393_v38, %v389_v36 }
 0x120   : > { %v397_v39 = vpop.f32.mrf.mxu0 }
 0x122   : > { %v399_v40 = vpop.f32.mrf.mxu0 }
 0x124   : > { %v401_v41 = vpop.f32.mrf.mxu0 }
 0x125   : > { %v2466_v57 = vpack.c.bf16 %v401_v41, %v397_v39 }
 0x126   : > { %v403_v42 = vpop.f32.mrf.mxu0 }
 0x127   : > { %v2462_v56 = vpack.c.bf16 %v403_v42, %v399_v40 }
 0x128   : > { %v407_v43 = vpop.f32.mrf.mxu0 }
 0x12a   : > { %v409_v44 = vpop.f32.mrf.mxu0 }
 0x12c   : > { %v411_v45 = vpop.f32.mrf.mxu0 }
 0x12d   : > { %v2460_v55 = vpack.c.bf16 %v411_v45, %v407_v43 }
 0x12e   : > { %v413_v46 = vpop.f32.mrf.mxu0 }
 0x12f   : > { %v2451_v52 = vpack.c.bf16 %v413_v46, %v409_v44 }
 0x130   : > { %v417_v47 = vpop.f32.mrf.mxu0 }
 0x131   : > { %v432_v48 = vpack.c.bf16 %v417_v47, %v417_v47 }
 0x132   : > { %v419_v49 = vpop.f32.mrf.mxu0 }
 0x133   : > { %v2449_v50 = vpack.c.bf16 %v419_v49, %v419_v49  ;;  %v2456_v53 = vsel %vm336_vm0, %v432_v48, 0 }
 0x134   : > { %v421_v51 = vpop.f32.mrf.mxu0 }
 0x135   : > { %1874 = vmatprep.subr.msk.bf16.mxu1 %vm336_vm0, %v2449_v50 }
 0x136   : > { %v422_v54 = vpop.f32.mrf.mxu0  ;;  %524 = vmatpush1.bf16.msra.mxu1 %v2456_v53 }
 0x137   : > { %525 = vmatprep.subr.bf16.mxu1 %v2451_v52 }
 0x13a   : > { %526 = vmatpush1.bf16.msra.mxu1 %v2460_v55 }
 0x13b   : > { %527 = vmatprep.subr.bf16.mxu1 %v2462_v56 }
 0x13e   : > { %528 = vmatpush1.bf16.msra.mxu1 %v2466_v57 }
 0x13f   : > { %529 = vmatprep.subr.bf16.mxu1 %v2468_v58 }
 0x142   : > { %530 = vmatpush1.bf16.msra.mxu1 %v2472_v59 }
 0x143   : > { %531 = vmatprep.subr.bf16.mxu1 %v2474_v60 }
 0x146   : > { %532 = vmatpush1.bf16.msra.mxu1 %v2478_v61 }
 0x149   : > { %1875 = vmatmul.mubr.msk.bf16.vlgmr.msra.gmra.mxu1 %vm320_vm1, %v479_v62 }
 0x14a   : > { %559 = vmatprep.mubr.bf16.mxu1 %v2948_v0 }
 0x151   : > { %1876 = vmatmul.mubr.msk.bf16.gmra.mxu1 %vm320_vm1, %v480_v63 }
 0x152   : > { %569 = vmatprep.mubr.bf16.mxu1 %v2948_v0 }
 0x159   : > { %1877 = vmatmul.mubr.msk.bf16.gmra.mxu1 %vm320_vm1, %v481_v1 }
 0x15a   : > { %579 = vmatprep.mubr.bf16.mxu1 %v2948_v0 }
 0x161   : > { %1878 = vmatmul.mubr.msk.bf16.gmra.mxu1 %vm320_vm1, %v482_v2 }
 0x162   : > { %589 = vmatprep.mubr.bf16.mxu1 %v2948_v0 }
 0x169   : > { %1879 = vmatmul.mubr.msk.bf16.gmra.mxu1 %vm320_vm1, %v483_v3 }
 0x16a   : > { %599 = vmatprep.mubr.bf16.mxu1 %v2948_v0 }
 0x171   : > { %1880 = vmatmul.mubr.msk.bf16.gmra.mxu1 %vm320_vm1, %v484_v4 }
 0x172   : > { %609 = vmatprep.mubr.bf16.mxu1 %v2948_v0 }
 0x179   : > { %1881 = vmatmul.mubr.msk.bf16.gmra.mxu1 %vm320_vm1, %v485_v5 }
 0x17a   : > { %619 = vmatprep.mubr.bf16.mxu1 %v2948_v0 }
 0x181   : > { %1882 = vmatmul.mubr.msk.bf16.gmra.mxu1 %vm320_vm1, %v486_v6 }
 0x182   : > { %903 = vmatprep.mubr.bf16.mxu1 %v2948_v0 }
 0x209   : > { %v2497_v7 = vpop.f32.mrf.mxu1 }
 0x20b   : > { %v2499_v8 = vpop.f32.mrf.mxu1 }
 0x20d   : > { %v2501_v9 = vpop.f32.mrf.mxu1 }
 0x20f   : > { %v2503_v12 = vpop.f32.mrf.mxu1 }
 0x210   : > { %v633_v45 = vmax.f32 %v2501_v9, %v2503_v12 }
 0x211   : > { %v2505_v15 = vpop.f32.mrf.mxu1 }
 0x213   : > { %v2507_v16 = vpop.f32.mrf.mxu1 }
 0x215   : > { %v2509_v18 = vpop.f32.mrf.mxu1 }
 0x217   : > { %v2511_v20 = vpop.f32.mrf.mxu1 }
 0x218   : > { %v639_v42 = vmax.f32 %v2509_v18, %v2511_v20 }
 0x219   : > { %v2513_v21 = vpop.f32.mrf.mxu1 }
 0x21b   : > { %v2515_v24 = vpop.f32.mrf.mxu1 }
 0x21c   : > { %v642_v6 = vmax.f32 %v2513_v21, %v2515_v24 }
 0x21d   : > { %v2517_v25 = vpop.f32.mrf.mxu1 }
 0x21f   : > { %v2519_v26 = vpop.f32.mrf.mxu1 }
 0x221   : > { %v2521_v27 = vpop.f32.mrf.mxu1 }
 0x223   : > { %v2523_v28 = vpop.f32.mrf.mxu1 }
 0x224   : > { %v648_v4 = vmax.f32 %v2521_v27, %v2523_v28 }
 0x225   : > { %v2525_v29 = vpop.f32.mrf.mxu1 }
 0x227   : > { %v2527_v30 = vpop.f32.mrf.mxu1 }
 0x228   : > { %v651_v5 = vmax.f32 %v2525_v29, %v2527_v30 }
 0x229   : > { %v2529_v31 = vpop.f32.mrf.mxu1 }
 0x22b   : > { %v2531_v32 = vpop.f32.mrf.mxu1 }
 0x22c   : > { %v654_v2 = vmax.f32 %v2529_v31, %v2531_v32 }
 0x22d   : > { %v2533_v33 = vpop.f32.mrf.mxu1 }
 0x22f   : > { %v2535_v34 = vpop.f32.mrf.mxu1 }
 0x230   : > { %v657_v3 = vmax.f32 %v2533_v33, %v2535_v34 }
 0x231   : > { %v2537_v35 = vpop.f32.mrf.mxu1 }
 0x233   : > { %v2539_v36 = vpop.f32.mrf.mxu1 }
 0x234   : > { %v660_v1 = vmax.f32 %v2537_v35, %v2539_v36 }
 0x235   : > { %v2541_v37 = vpop.f32.mrf.mxu1 }
 0x237   : > { %v2543_v38 = vpop.f32.mrf.mxu1 }
 0x238   : > { %v663_v39 = vmax.f32 %v2541_v37, %v2543_v38 }
 0x239   : > { %v2547_v40 = vpop.f32.mrf.mxu1 }
 0x23a   : > { %664 = vmax.xlane.f32.xlu0 %v663_v39  ;;  %v645_v39 = vmax.f32 %v2517_v25, %v2519_v26 }
 0x23b   : > { %v2549_v41 = vpop.f32.mrf.mxu1 }
 0x23c   : > { %v666_v62 = vmax.f32 %v2547_v40, %v2549_v41 }
 0x23d   : > { %v2553_v43 = vpop.f32.mrf.mxu1 }
 0x23e   : > { %640 = vmax.xlane.f32.xlu0 %v639_v42  ;;  %v636_v42 = vmax.f32 %v2505_v15, %v2507_v16 }
 0x23f   : > { %v2555_v44 = vpop.f32.mrf.mxu1 }
 0x240   : > { %v669_v63 = vmax.f32 %v2553_v43, %v2555_v44 }
 0x241   : > { %v621_v46 = vpop.f32.mrf.mxu1 }
 0x242   : > { %634 = vmax.xlane.f32.xlu0 %v633_v45  ;;  %v630_v45 = vmax.f32 %v2497_v7, %v2499_v8 }
 0x243   : > { %v623_v47 = vpop.f32.mrf.mxu1 }
 0x244   : > { %v672_v48 = vmax.f32 %v621_v46, %v623_v47 }
 0x245   : > { %v625_v49 = vpop.f32.mrf.mxu1 }
 0x246   : > { %673 = vmax.xlane.f32.xlu1 %v672_v48  ;;  %v1883_v48 = vld [vmem:[%s2372_s20 + $0x4] sm:$0xf] }
 0x247   : > { %v627_v51 = vpop.f32.mrf.mxu1 }
 0x248   : > { %v675_v54 = vmax.f32 %v625_v49, %v627_v51 }
 0x24a   : > { %676 = vmax.xlane.f32.xlu1 %v675_v54  ;;  %v1884_v54 = vld [vmem:[%s2372_s20 + $0xc] sm:$0xf] }
 0x24e   : > { %667 = vmax.xlane.f32.xlu1 %v666_v62  ;;  %v1892_v62 = vcombine.low %v1883_v48, %v1884_v54  ;;  %v2963_v48 = vmov 0  }
 0x252   : > { %670 = vmax.xlane.f32.xlu1 %v669_v63  ;;  %v1885_v63 = vld [vmem:[%s2372_s20 + $0x14] sm:$0xf] }
 0x256   : > { %661 = vmax.xlane.f32.xlu1 %v660_v1  ;;  %v1886_v1 = vld [vmem:[%s2372_s20 + $0x1c] sm:$0xf] }
 0x25a   : > { %655 = vmax.xlane.f32.xlu1 %v654_v2  ;;  %v1893_v2 = vcombine.low %v1885_v63, %v1886_v1 }
 0x25e   : > { %658 = vmax.xlane.f32.xlu1 %v657_v3  ;;  %v1887_v3 = vld [vmem:[%s2372_s20 + $0x24] sm:$0xf] }
 0x262   : > { %649 = vmax.xlane.f32.xlu1 %v648_v4  ;;  %v1888_v4 = vld [vmem:[%s2372_s20 + $0x2c] sm:$0xf] }
 0x266   : > { %652 = vmax.xlane.f32.xlu1 %v651_v5  ;;  %v2248_v5 = vmov 1065369472  }
 0x267   : > { %822 = vmatprep.mubr.bf16.mxu0 %v2248_v5 }
 0x26a   : > { %643 = vmax.xlane.f32.xlu1 %v642_v6  ;;  %v1894_v6 = vcombine.low %v1887_v3, %v1888_v4 }
 0x26e   : > { %646 = vmax.xlane.f32.xlu1 %v645_v39  ;;  %v1889_v39 = vld [vmem:[%s2372_s20 + $0x34] sm:$0xf] }
 0x272   : > { %637 = vmax.xlane.f32.xlu1 %v636_v42  ;;  %v1890_v42 = vld [vmem:[%s2372_s20 + $0x3c] sm:$0xf] }
 0x273   : > { %v1895_v0 = vcombine.low %v1889_v39, %v1890_v42 }
 0x276   : > { %631 = vmax.xlane.f32.xlu1 %v630_v45  ;;  %v2005_v45 = vld [vmem:[%s2372_s20 + $0x44] ss:$0 sps:$4 sm:$0xff]  }
 0x2a3   : > { %1014 = vxpose.xlu1.c.b16.start [1/5] (short) %v1892_v62, 128 }
 0x2a7   : > { %1015 = vxpose.xlu1.c.b16.cont [2/5] (short) %v1893_v2, 128 }
 0x2ab   : > { %1016 = vxpose.xlu1.c.b16.cont [3/5] (short) %v1894_v6, 128 }
 0x2af   : > { %1017 = vxpose.xlu1.c.b16.cont [4/5] (short) %v1895_v0, 128 }
 0x2b3   : > { %1018 = vxpose.xlu1.c.b16.end [5/5] (short) %v2005_v45, 128 }
 0x2b7   : > { %1975 = vset.pattern.permute.xlu1 %v2963_v48 }
 0x2c3   : > { %v665_v4 = vpop.xlane.xlu0 %664 }
 0x2cf   : > { %v674_v54 = vpop.xlane.xlu1 %673 }
 0x2d0   : > { %v706_v23 = vsub.f32 %v621_v46, %v674_v54  ;;  %v707_v62 = vsub.f32 %v623_v47, %v674_v54  ;;  %v700_v46 = vsub.f32 %v2541_v37, %v665_v4 }
 0x2d2   : > { %v766_v63 = vmul.f32 1.442695, %v706_v23  ;;  %v768_v1 = vmul.f32 1.442695, %v707_v62  ;;  %v701_v23 = vsub.f32 %v2543_v38, %v665_v4 }
 0x2d3   : > { %v677_v22 = vpop.xlane.xlu1 %676 }
 0x2d4   : > { %v708_v19 = vsub.f32 %v625_v49, %v677_v22  ;;  %v709_v17 = vsub.f32 %v627_v51, %v677_v22  ;;  %2010 = vpow2.f32 %v766_v63  ;;  %v756_v54 = vmul.f32 1.442695, %v701_v23 }
 0x2d5   : > { %2012 = vpow2.f32 %v768_v1 }
 0x2d6   : > { %v770_v2 = vmul.f32 1.442695, %v708_v19  ;;  %v772_v3 = vmul.f32 1.442695, %v709_v17  ;;  %v754_v19 = vmul.f32 1.442695, %v700_v46 }
 0x2d7   : > { %v668_v6 = vpop.xlane.xlu1 %667 }
 0x2d8   : > { %2014 = vpow2.f32 %v770_v2  ;;  %v702_v0 = vsub.f32 %v2547_v40, %v668_v6  ;;  %v703_v39 = vsub.f32 %v2549_v41, %v668_v6 }
 0x2d9   : > { %2016 = vpow2.f32 %v772_v3 }
 0x2da   : > { %v758_v47 = vmul.f32 1.442695, %v702_v0  ;;  %v760_v42 = vmul.f32 1.442695, %v703_v39 }
 0x2db   : > { %v671_v49 = vpop.xlane.xlu1 %670 }
 0x2dc   : > { %v704_v22 = vsub.f32 %v2553_v43, %v671_v49  ;;  %v705_v17 = vsub.f32 %v2555_v44, %v671_v49  ;;  %2018 = vpow2.f32 %v758_v47 }
 0x2dd   : > { %2020 = vpow2.f32 %v760_v42 }
 0x2de   : > { %v762_v51 = vmul.f32 1.442695, %v704_v22  ;;  %v764_v45 = vmul.f32 1.442695, %v705_v17 }
 0x2df   : > { %v662_v40 = vpop.xlane.xlu1 %661 }
 0x2e0   : > { %2022 = vpow2.f32 %v762_v51  ;;  %v698_v41 = vsub.f32 %v2537_v35, %v662_v40  ;;  %v699_v37 = vsub.f32 %v2539_v36, %v662_v40 }
 0x2e1   : > { %2024 = vpow2.f32 %v764_v45  ;;  %v2011_v63 = vpop.eup %2010 }
 0x2e2   : > { %2026 = vpow2.f32 %v754_v19  ;;  %v750_v38 = vmul.f32 1.442695, %v698_v41  ;;  %v752_v62 = vmul.f32 1.442695, %v699_v37  ;;  %v2013_v44 = vpop.eup %2012 }
 0x2e3   : > { %2028 = vpow2.f32 %v756_v54  ;;  %v656_v43 = vpop.xlane.xlu1 %655 }
 0x2e4   : > { %2030 = vpow2.f32 %v750_v38  ;;  %v694_v1 = vsub.f32 %v2529_v31, %v656_v43  ;;  %v695_v2 = vsub.f32 %v2531_v32, %v656_v43  ;;  %v641_v38 = vpop.xlane.xlu0 %640 }
 0x2e5   : > { %v2015_v3 = vpop.eup %2014  ;;  %2032 = vpow2.f32 %v752_v62 }
 0x2e6   : > { %v2017_v4 = vpop.eup %2016  ;;  %v742_v6 = vmul.f32 1.442695, %v694_v1  ;;  %v788_v35 = vpack.c.bf16 %v2015_v3, %v2011_v63  ;;  %v744_v0 = vmul.f32 1.442695, %v695_v2 }
 0x2e7   : > { %v659_v36 = vpop.xlane.xlu1 %658  ;;  %v789_v39 = vpack.c.bf16 %v2017_v4, %v2013_v44 }
 0x2e8   : > { %v696_v46 = vsub.f32 %v2533_v33, %v659_v36  ;;  %v697_v47 = vsub.f32 %v2535_v34, %v659_v36  ;;  %2034 = vpow2.f32 %v742_v6  ;;  %v635_v6 = vpop.xlane.xlu0 %634  ;;  %v685_v36 = vsub.f32 %v2511_v20, %v641_v38 }
 0x2e9   : > { %790 = vmatprep.subr.bf16.mxu0 %v789_v39  ;;  %871 = vmatprep.subr.bf16.mxu1 %v789_v39  ;;  %v2019_v31 = vpop.eup %2018  ;;  %2036 = vpow2.f32 %v744_v0  ;;  %v681_v20 = vsub.f32 %v2503_v12, %v635_v6 }
 0x2ea   : > { %v746_v23 = vmul.f32 1.442695, %v696_v46  ;;  %v748_v42 = vmul.f32 1.442695, %v697_v47  ;;  %791 = vmatpush1.bf16.xpose.msra.mxu0 %v788_v35  ;;  %872 = vmatpush1.bf16.msra.mxu1 %v788_v35  ;;  %v2021_v49 = vpop.eup %2020 }
 0x2eb   : > { %v650_v32 = vpop.xlane.xlu1 %649 }
 0x2ec   : > { %2038 = vpow2.f32 %v746_v23  ;;  %v690_v22 = vsub.f32 %v2521_v27, %v650_v32  ;;  %v691_v17 = vsub.f32 %v2523_v28, %v650_v32 }
 0x2ed   : > { %v2023_v19 = vpop.eup %2022  ;;  %2040 = vpow2.f32 %v748_v42 }
 0x2ee   : > { %v2025_v33 = vpop.eup %2024  ;;  %v734_v34 = vmul.f32 1.442695, %v690_v22  ;;  %v786_v51 = vpack.c.bf16 %v2023_v19, %v2019_v31  ;;  %v736_v54 = vmul.f32 1.442695, %v691_v17  ;;  %v724_v17 = vmul.f32 1.442695, %v685_v36 }
 0x2ef   : > { %v2027_v45 = vpop.eup %2026  ;;  %v653_v40 = vpop.xlane.xlu1 %652  ;;  %v787_v41 = vpack.c.bf16 %v2025_v33, %v2021_v49 }
 0x2f0   : > { %v2029_v37 = vpop.eup %2028  ;;  %v692_v62 = vsub.f32 %v2525_v29, %v653_v40  ;;  %v693_v63 = vsub.f32 %v2527_v30, %v653_v40  ;;  %2042 = vpow2.f32 %v734_v34  ;;  %v684_v30 = vsub.f32 %v2509_v18, %v641_v38 }
 0x2f1   : > { %v2031_v43 = vpop.eup %2030  ;;  %792 = vmatprep.subr.bf16.mxu0 %v787_v41  ;;  %873 = vmatprep.subr.bf16.mxu1 %v787_v41  ;;  %2044 = vpow2.f32 %v736_v54  ;;  %v680_v18 = vsub.f32 %v2501_v9, %v635_v6  ;;  %v716_v54 = vmul.f32 1.442695, %v681_v20  ;;  %v2964_v20 = vld [vmem:[#allocation9_spill] sm:$0xff] }
 0x2f2   : > { %v2033_v27 = vpop.eup %2032  ;;  %v738_v28 = vmul.f32 1.442695, %v692_v62  ;;  %v740_v44 = vmul.f32 1.442695, %v693_v63  ;;  %793 = vmatpush1.bf16.xpose.msra.mxu0 %v786_v51  ;;  %874 = vmatpush1.bf16.msra.mxu1 %v786_v51  ;;  %v784_v1 = vpack.c.bf16 %v2027_v45, %v2031_v43 }
 0x2f3   : > { %v644_v2 = vpop.xlane.xlu1 %643  ;;  %v785_v3 = vpack.c.bf16 %v2029_v37, %v2033_v27  ;;  %v714_v9 = vmul.f32 1.442695, %v680_v18 }
 0x2f4   : > { %2046 = vpow2.f32 %v738_v28  ;;  %v686_v4 = vsub.f32 %v2513_v21, %v644_v2  ;;  %v687_v29 = vsub.f32 %v2515_v24, %v644_v2  ;;  %v722_v24 = vmul.f32 1.442695, %v684_v30 }
 0x2f5   : > { %2048 = vpow2.f32 %v740_v44  ;;  %794 = vmatprep.subr.bf16.mxu0 %v785_v3  ;;  %875 = vmatprep.subr.bf16.mxu1 %v785_v3  ;;  %v2035_v0 = vpop.eup %2034 }
 0x2f6   : > { %v726_v35 = vmul.f32 1.442695, %v686_v4  ;;  %876 = vmatpush1.bf16.msra.mxu1 %v784_v1  ;;  %v728_v39 = vmul.f32 1.442695, %v687_v29  ;;  %v2037_v47 = vpop.eup %2036 }
 0x2f7   : > { %v647_v46 = vpop.xlane.xlu1 %646 }
 0x2f8   : > { %v688_v23 = vsub.f32 %v2517_v25, %v647_v46  ;;  %v689_v21 = vsub.f32 %v2519_v26, %v647_v46  ;;  %2050 = vpow2.f32 %v726_v35 }
 0x2f9   : > { %v2039_v42 = vpop.eup %2038  ;;  %2052 = vpow2.f32 %v728_v39 }
 0x2fa   : > { %v2041_v31 = vpop.eup %2040  ;;  %v730_v32 = vmul.f32 1.442695, %v688_v23  ;;  %v732_v49 = vmul.f32 1.442695, %v689_v21  ;;  %795 = vmatpush1.bf16.xpose.msra.mxu0 %v784_v1  ;;  %v782_v22 = vpack.c.bf16 %v2039_v42, %v2035_v0  ;;  %v839_v23 = vlaneseq }
 0x2fb   : > { %v638_v19 = vpop.xlane.xlu1 %637  ;;  %v783_v33 = vpack.c.bf16 %v2041_v31, %v2037_v47  ;;  %v831_v31 = vunpack.c.l.bf16 %v2389_v10 }
 0x2fc   : > { %2054 = vpow2.f32 %v730_v32  ;;  %v682_v25 = vsub.f32 %v2505_v15, %v638_v19  ;;  %v683_v26 = vsub.f32 %v2507_v16, %v638_v19  ;;  %v832_v32 = vunpack.c.l.bf16 %v2392_v11 }
 0x2fd   : > { %2056 = vpow2.f32 %v732_v49  ;;  %796 = vmatprep.subr.bf16.mxu0 %v783_v33  ;;  %877 = vmatprep.subr.bf16.mxu1 %v783_v33  ;;  %v2043_v45 = vpop.eup %2042  ;;  %v833_v49 = vunpack.c.l.bf16 %v2397_v13  ;;  %v835_v19 = vunpack.c.l.bf16 %v2964_v20  ;;  %v2965_v33 = vld [vmem:[#allocation10_spill] sm:$0xff] }
 0x2fe   : > { %2058 = vpow2.f32 %v722_v24  ;;  %v718_v34 = vmul.f32 1.442695, %v682_v25  ;;  %v720_v51 = vmul.f32 1.442695, %v683_v26  ;;  %878 = vmatpush1.bf16.msra.mxu1 %v782_v22  ;;  %v2045_v40 = vpop.eup %2044  ;;  %v2649_v24 = vshrl.u32 %v839_v23, 7  ;;  %v2966_v26 = vld [vmem:[#allocation11_spill] sm:$0xff] }
 0x2ff   : > { %2060 = vpow2.f32 %v724_v17  ;;  %v632_v12 = vpop.xlane.xlu1 %631  ;;  %v836_v25 = vunpack.c.l.bf16 %v2965_v33 }
 0x300   : > { %2062 = vpow2.f32 %v718_v34  ;;  %v678_v41 = vsub.f32 %v2497_v7, %v632_v12  ;;  %v679_v15 = vsub.f32 %v2499_v8, %v632_v12  ;;  %v841_v18 = vsub.s32 0, %v2649_v24  ;;  %v2967_v34 = vld [vmem:[#allocation12_spill] sm:$0xff]  ;;  %v1545_v24 = vld [vmem:[%s2944_s3] sm:$0xff] }
 0x301   : > { %v2047_v37 = vpop.eup %2046  ;;  %2064 = vpow2.f32 %v720_v51  ;;  %v838_v51 = vunpack.c.l.bf16 %v2967_v34  ;;  %1555 = vperm.xlu1 %1975, %v1545_v24  }
 0x302   : > { %v2049_v16 = vpop.eup %2048  ;;  %2066 = vpow2.f32 %v714_v9  ;;  %v710_v38 = vmul.f32 1.442695, %v678_v41  ;;  %v712_v62 = vmul.f32 1.442695, %v679_v15  ;;  %797 = vmatpush1.bf16.xpose.msra.mxu0 %v782_v22  ;;  %v780_v63 = vpack.c.bf16 %v2047_v37, %v2043_v45 }
 0x303   : > { %2068 = vpow2.f32 %v716_v54  ;;  %v781_v43 = vpack.c.bf16 %v2049_v16, %v2045_v40  ;;  %v834_v22 = vunpack.c.l.bf16 %v2400_v14  ;;  %v837_v9 = vunpack.c.l.bf16 %v2966_v26 }
 0x304   : > { %2070 = vpow2.f32 %v710_v38 }
 0x305   : > { %2072 = vpow2.f32 %v712_v62  ;;  %798 = vmatprep.subr.bf16.mxu0 %v781_v43  ;;  %879 = vmatprep.subr.bf16.mxu1 %v781_v43  ;;  %v2051_v27 = vpop.eup %2050 }
 0x306   : > { %880 = vmatpush1.bf16.msra.mxu1 %v780_v63  ;;  %v2053_v28 = vpop.eup %2052 }
 0x309   : > { %v2055_v7 = vpop.eup %2054 }
 0x30a   : > { %v2057_v44 = vpop.eup %2056  ;;  %799 = vmatpush1.bf16.xpose.msra.mxu0 %v780_v63  ;;  %v778_v8 = vpack.c.bf16 %v2055_v7, %v2051_v27 }
 0x30b   : > { %v2059_v1 = vpop.eup %2058  ;;  %v779_v2 = vpack.c.bf16 %v2057_v44, %v2053_v28 }
 0x30c   : > { %v2061_v3 = vpop.eup %2060 }
 0x30d   : > { %v2063_v4 = vpop.eup %2062  ;;  %800 = vmatprep.subr.bf16.mxu0 %v779_v2  ;;  %881 = vmatprep.subr.bf16.mxu1 %v779_v2 }
 0x30e   : > { %v2065_v29 = vpop.eup %2064  ;;  %882 = vmatpush1.bf16.msra.mxu1 %v778_v8  ;;  %v776_v30 = vpack.c.bf16 %v2059_v1, %v2063_v4 }
 0x30f   : > { %v2067_v6 = vpop.eup %2066  ;;  %v777_v35 = vpack.c.bf16 %v2061_v3, %v2065_v29 }
 0x310   : > { %v2069_v0 = vpop.eup %2068 }
 0x311   : > { %v2071_v36 = vpop.eup %2070  ;;  %883 = vmatprep.subr.bf16.mxu1 %v777_v35 }
 0x312   : > { %v2073_v39 = vpop.eup %2072  ;;  %801 = vmatpush1.bf16.xpose.msra.mxu0 %v778_v8  ;;  %884 = vmatpush1.bf16.msra.mxu1 %v776_v30  ;;  %v774_v46 = vpack.c.bf16 %v2067_v6, %v2071_v36 }
 0x313   : > { %802 = vmatprep.subr.bf16.mxu0 %v777_v35  ;;  %v775_v47 = vpack.c.bf16 %v2069_v0, %v2073_v39 }
 0x315   : > { %885 = vmatprep.subr.bf16.mxu1 %v775_v47 }
 0x316   : > { %886 = vmatpush1.bf16.msra.mxu1 %v774_v46 }
 0x31a   : > { %803 = vmatpush1.bf16.xpose.msra.mxu0 %v776_v30 }
 0x31b   : > { %804 = vmatprep.subr.bf16.mxu0 %v775_v47 }
 0x322   : > { %805 = vmatpush1.bf16.xpose.msra.mxu0 %v774_v46 }
 0x323   : > { %1897 = vmatprep.subr.msk.bf16.mxu0 %vm336_vm0, %v2449_v50  ;;  %v1022_v50 = vpop.trf.xlu1 }
 0x329   : > { %823 = vmatmul.mubr.bf16.vlgmr.msra.gmra.mxu0 %v2248_v5 }
 0x32a   : > { %1061 = vmatpush1.bf16.msra.mxu0 %v2456_v53  ;;  %1086 = vmatprep.mubr.bf16.mxu0 %v2963_v48 }
 0x32b   : > { %1062 = vmatprep.subr.bf16.mxu0 %v2451_v52  ;;  %v1023_v52 = vpop.trf.xlu1 }
 0x32e   : > { %1063 = vmatpush1.bf16.msra.mxu0 %v2460_v55 }
 0x32f   : > { %1064 = vmatprep.subr.bf16.mxu0 %v2462_v56  ;;  %v1024_v53 = vpop.trf.xlu1 }
 0x332   : > { %1065 = vmatpush1.bf16.msra.mxu0 %v2466_v57 }
 0x333   : > { %1066 = vmatprep.subr.bf16.mxu0 %v2468_v58  ;;  %v1025_v55 = vpop.trf.xlu1 }
 0x336   : > { %1067 = vmatpush1.bf16.msra.mxu0 %v2472_v59 }
 0x337   : > { %1068 = vmatprep.subr.bf16.mxu0 %v2474_v60  ;;  %v1026_v56 = vpop.trf.xlu1 }
 0x33a   : > { %1069 = vmatpush1.bf16.msra.mxu0 %v2478_v61 }
 0x33b   : > { %v1027_v57 = vpop.trf.xlu1 }
 0x33d   : > { %1898 = vmatmul.mubr.msk.bf16.vlgmr.msra.gmra.mxu0 %vm320_vm1, %v1022_v50 }
 0x33e   : > { %1096 = vmatprep.mubr.bf16.mxu0 %v2963_v48 }
 0x33f   : > { %v1028_v58 = vpop.trf.xlu1 }
 0x343   : > { %v1029_v59 = vpop.trf.xlu1 }
 0x345   : > { %1899 = vmatmul.mubr.msk.bf16.gmra.mxu0 %vm320_vm1, %v1023_v52 }
 0x346   : > { %1106 = vmatprep.mubr.bf16.mxu0 %v2963_v48 }
 0x34d   : > { %1900 = vmatmul.mubr.msk.bf16.gmra.mxu0 %vm320_vm1, %v1024_v53 }
 0x34e   : > { %1116 = vmatprep.mubr.bf16.mxu0 %v2963_v48 }
 0x355   : > { %1901 = vmatmul.mubr.msk.bf16.gmra.mxu0 %vm320_vm1, %v1025_v55 }
 0x356   : > { %1126 = vmatprep.mubr.bf16.mxu0 %v2963_v48 }
 0x35d   : > { %1902 = vmatmul.mubr.msk.bf16.gmra.mxu0 %vm320_vm1, %v1026_v56 }
 0x35e   : > { %1136 = vmatprep.mubr.bf16.mxu0 %v2963_v48 }
 0x365   : > { %1903 = vmatmul.mubr.msk.bf16.gmra.mxu0 %vm320_vm1, %v1027_v57 }
 0x366   : > { %1146 = vmatprep.mubr.bf16.mxu0 %v2963_v48 }
 0x36d   : > { %1904 = vmatmul.mubr.msk.bf16.gmra.mxu0 %vm320_vm1, %v1028_v58 }
 0x36e   : > { %1156 = vmatprep.mubr.bf16.mxu0 %v2963_v48 }
 0x375   : > { %1905 = vmatmul.mubr.msk.bf16.gmra.mxu0 %vm320_vm1, %v1029_v59 }
 0x376   : > { %1440 = vmatprep.mubr.bf16.mxu0 %v2963_v48 }
 0x3e9   : > { %v824_v60 = vpop.f32.mrf.mxu0 }
 0x3ea   : > { %2074 = vrcp.f32 %v824_v60 }
 0x3eb   : > { %v826_v61 = vpop.f32.mrf.mxu0 }
 0x3ed   : > { %v827_v21 = vpop.f32.mrf.mxu0 }
 0x3ef   : > { %v828_v42 = vpop.f32.mrf.mxu0 }
 0x3f7   : > { %v2075_v17 = vpop.eup %2074 }
 0x3f8   : > { %v842_v45 = vrot.slane %v2075_v17, %v841_v18 }
 0x3fa   : > { %v843_v54 = vmul.f32 %v842_v45, %v831_v31  ;;  %v844_v10 = vmul.f32 %v842_v45, %v832_v32  ;;  %v845_v12 = vmul.f32 %v842_v45, %v833_v49  ;;  %v846_v11 = vmul.f32 %v842_v45, %v834_v22 }
 0x3fb   : > { %v847_v40 = vmul.f32 %v842_v45, %v835_v19  ;;  %v848_v13 = vmul.f32 %v842_v45, %v836_v25  ;;  %v849_v41 = vmul.f32 %v842_v45, %v837_v9  ;;  %v850_v14 = vmul.f32 %v842_v45, %v838_v51 }
 0x3fc   : > { %v851_v15 = vpack.c.bf16 %v844_v10, %v843_v54  ;;  %v852_v37 = vpack.c.bf16 %v846_v11, %v845_v12 }
 0x3fd   : > { %v2662_v16 = vpop.f32.mrf.mxu0  ;;  %v853_v38 = vpack.c.bf16 %v848_v13, %v847_v40  ;;  %v854_v62 = vpack.c.bf16 %v850_v14, %v849_v41 }
 0x3fe   : > { %904 = vmatmul.mubr.bf16.vlgmr.msra.gmra.mxu1 %v851_v15 }
 0x3ff   : > { %v2664_v63 = vpop.f32.mrf.mxu0  ;;  %913 = vmatprep.mubr.bf16.mxu1 %v2963_v48 }
 0x400   : > { %v1167_v51 = vmax.f32 %v2662_v16, %v2664_v63 }
 0x401   : > { %v2667_v43 = vpop.f32.mrf.mxu0 }
 0x403   : > { %v2669_v27 = vpop.f32.mrf.mxu0 }
 0x404   : > { %v1170_v45 = vmax.f32 %v2667_v43, %v2669_v27 }
 0x405   : > { %v2671_v28 = vpop.f32.mrf.mxu0 }
 0x406   : > { %914 = vmatmul.mubr.bf16.gmra.mxu1 %v852_v37 }
 0x407   : > { %v2673_v7 = vpop.f32.mrf.mxu0  ;;  %923 = vmatprep.mubr.bf16.mxu1 %v2963_v48 }
 0x408   : > { %v1173_v9 = vmax.f32 %v2671_v28, %v2673_v7 }
 0x409   : > { %v2676_v44 = vpop.f32.mrf.mxu0 }
 0x40b   : > { %v2678_v8 = vpop.f32.mrf.mxu0 }
 0x40c   : > { %v1176_v34 = vmax.f32 %v2676_v44, %v2678_v8 }
 0x40d   : > { %v2680_v1 = vpop.f32.mrf.mxu0 }
 0x40e   : > { %924 = vmatmul.mubr.bf16.gmra.mxu1 %v853_v38 }
 0x40f   : > { %v2682_v2 = vpop.f32.mrf.mxu0  ;;  %933 = vmatprep.mubr.bf16.mxu1 %v2963_v48 }
 0x410   : > { %v1179_v25 = vmax.f32 %v2680_v1, %v2682_v2 }
 0x411   : > { %v2685_v3 = vpop.f32.mrf.mxu0 }
 0x413   : > { %v2687_v4 = vpop.f32.mrf.mxu0 }
 0x414   : > { %v1182_v26 = vmax.f32 %v2685_v3, %v2687_v4 }
 0x415   : > { %v2689_v29 = vpop.f32.mrf.mxu0 }
 0x416   : > { %934 = vmatmul.mubr.bf16.gmra.mxu1 %v854_v62 }
 0x417   : > { %v2691_v30 = vpop.f32.mrf.mxu0  ;;  %1359 = vmatprep.mubr.bf16.mxu1 %v2248_v5 }
 0x418   : > { %v1185_v19 = vmax.f32 %v2689_v29, %v2691_v30 }
 0x419   : > { %v2694_v6 = vpop.f32.mrf.mxu0 }
 0x41b   : > { %v2696_v35 = vpop.f32.mrf.mxu0 }
 0x41c   : > { %v1188_v33 = vmax.f32 %v2694_v6, %v2696_v35 }
 0x41d   : > { %v2698_v0 = vpop.f32.mrf.mxu0 }
 0x41f   : > { %v2700_v36 = vpop.f32.mrf.mxu0 }
 0x420   : > { %v1191_v17 = vmax.f32 %v2698_v0, %v2700_v36 }
 0x421   : > { %v2702_v39 = vpop.f32.mrf.mxu0 }
 0x423   : > { %v2704_v46 = vpop.f32.mrf.mxu0 }
 0x424   : > { %v1194_v20 = vmax.f32 %v2702_v39, %v2704_v46 }
 0x425   : > { %v2706_v47 = vpop.f32.mrf.mxu0 }
 0x427   : > { %v2708_v50 = vpop.f32.mrf.mxu0 }
 0x428   : > { %v1197_v49 = vmax.f32 %v2706_v47, %v2708_v50 }
 0x429   : > { %v2710_v52 = vpop.f32.mrf.mxu0 }
 0x42b   : > { %v2712_v53 = vpop.f32.mrf.mxu0 }
 0x42c   : > { %v1200_v22 = vmax.f32 %v2710_v52, %v2712_v53 }
 0x42d   : > { %v1148_v55 = vpop.f32.mrf.mxu0 }
 0x42f   : > { %v1150_v56 = vpop.f32.mrf.mxu0 }
 0x430   : > { %v1203_v31 = vmax.f32 %v1148_v55, %v1150_v56 }
 0x431   : > { %v1152_v57 = vpop.f32.mrf.mxu0 }
 0x433   : > { %v1154_v58 = vpop.f32.mrf.mxu0 }
 0x434   : > { %v1206_v32 = vmax.f32 %v1152_v57, %v1154_v58 }
 0x435   : > { %v1158_v59 = vpop.f32.mrf.mxu0 }
 0x437   : > { %v1160_v60 = vpop.f32.mrf.mxu0 }
 0x438   : > { %v1209_v61 = vmax.f32 %v1158_v59, %v1160_v60 }
 0x439   : > { %v1162_v23 = vpop.f32.mrf.mxu0 }
 0x43a   : > { %1210 = vmax.xlane.f32.xlu0 %v1209_v61 }
 0x43b   : > { %v1164_v21 = vpop.f32.mrf.mxu0 }
 0x43c   : > { %v1212_v42 = vmax.f32 %v1162_v23, %v1164_v21 }
 0x43e   : > { %1213 = vmax.xlane.f32.xlu0 %v1212_v42 }
 0x442   : > { %1204 = vmax.xlane.f32.xlu0 %v1203_v31 }
 0x446   : > { %1207 = vmax.xlane.f32.xlu0 %v1206_v32 }
 0x44a   : > { %1198 = vmax.xlane.f32.xlu0 %v1197_v49 }
 0x44e   : > { %1201 = vmax.xlane.f32.xlu0 %v1200_v22 }
 0x452   : > { %1192 = vmax.xlane.f32.xlu0 %v1191_v17 }
 0x456   : > { %1195 = vmax.xlane.f32.xlu0 %v1194_v20 }
 0x45a   : > { %1186 = vmax.xlane.f32.xlu0 %v1185_v19 }
 0x45e   : > { %1189 = vmax.xlane.f32.xlu0 %v1188_v33 }
 0x462   : > { %1180 = vmax.xlane.f32.xlu0 %v1179_v25 }
 0x466   : > { %1183 = vmax.xlane.f32.xlu0 %v1182_v26 }
 0x46a   : > { %1174 = vmax.xlane.f32.xlu0 %v1173_v9 }
 0x46e   : > { %1177 = vmax.xlane.f32.xlu0 %v1176_v34 }
 0x472   : > { %1168 = vmax.xlane.f32.xlu0 %v1167_v51 }
 0x476   : > { %1171 = vmax.xlane.f32.xlu0 %v1170_v45 }
 0x4c3   : > { %v1211_v54 = vpop.xlane.xlu0 %1210 }
 0x4c4   : > { %v1243_v10 = vsub.f32 %v1158_v59, %v1211_v54  ;;  %v1244_v12 = vsub.f32 %v1160_v60, %v1211_v54 }
 0x4c6   : > { %v1303_v11 = vmul.f32 1.442695, %v1243_v10  ;;  %v1305_v40 = vmul.f32 1.442695, %v1244_v12 }
 0x4c7   : > { %v1214_v13 = vpop.xlane.xlu0 %1213 }
 0x4c8   : > { %v1245_v41 = vsub.f32 %v1162_v23, %v1214_v13  ;;  %v1246_v14 = vsub.f32 %v1164_v21, %v1214_v13  ;;  %2076 = vpow2.f32 %v1303_v11 }
 0x4c9   : > { %2078 = vpow2.f32 %v1305_v40 }
 0x4ca   : > { %v1307_v15 = vmul.f32 1.442695, %v1245_v41  ;;  %v1309_v37 = vmul.f32 1.442695, %v1246_v14 }
 0x4cb   : > { %v1205_v38 = vpop.xlane.xlu0 %1204 }
 0x4cc   : > { %2080 = vpow2.f32 %v1307_v15  ;;  %v1239_v62 = vsub.f32 %v1148_v55, %v1205_v38  ;;  %v1240_v61 = vsub.f32 %v1150_v56, %v1205_v38 }
 0x4cd   : > { %2082 = vpow2.f32 %v1309_v37 }
 0x4ce   : > { %v1295_v42 = vmul.f32 1.442695, %v1239_v62  ;;  %v1297_v31 = vmul.f32 1.442695, %v1240_v61 }
 0x4cf   : > { %v1208_v32 = vpop.xlane.xlu0 %1207 }
 0x4d0   : > { %v1241_v49 = vsub.f32 %v1152_v57, %v1208_v32  ;;  %v1242_v59 = vsub.f32 %v1154_v58, %v1208_v32  ;;  %2084 = vpow2.f32 %v1295_v42 }
 0x4d1   : > { %2086 = vpow2.f32 %v1297_v31 }
 0x4d2   : > { %v1299_v60 = vmul.f32 1.442695, %v1241_v49  ;;  %v1301_v22 = vmul.f32 1.442695, %v1242_v59 }
 0x4d3   : > { %v1199_v23 = vpop.xlane.xlu0 %1198 }
 0x4d4   : > { %2088 = vpow2.f32 %v1299_v60  ;;  %v1235_v21 = vsub.f32 %v2706_v47, %v1199_v23  ;;  %v1236_v17 = vsub.f32 %v2708_v50, %v1199_v23 }
 0x4d5   : > { %2090 = vpow2.f32 %v1301_v22  ;;  %v2077_v55 = vpop.eup %2076 }
 0x4d6   : > { %v1287_v20 = vmul.f32 1.442695, %v1235_v21  ;;  %v1289_v56 = vmul.f32 1.442695, %v1236_v17  ;;  %v2079_v33 = vpop.eup %2078 }
 0x4d7   : > { %v1202_v19 = vpop.xlane.xlu0 %1201 }
 0x4d8   : > { %v1237_v25 = vsub.f32 %v2710_v52, %v1202_v19  ;;  %v1238_v57 = vsub.f32 %v2712_v53, %v1202_v19  ;;  %2092 = vpow2.f32 %v1287_v20 }
 0x4d9   : > { %v2081_v58 = vpop.eup %2080  ;;  %2094 = vpow2.f32 %v1289_v56 }
 0x4da   : > { %v2083_v26 = vpop.eup %2082  ;;  %v1291_v9 = vmul.f32 1.442695, %v1237_v25  ;;  %v1293_v34 = vmul.f32 1.442695, %v1238_v57  ;;  %v1325_v51 = vpack.c.bf16 %v2081_v58, %v2077_v55 }
 0x4db   : > { %v1193_v47 = vpop.xlane.xlu0 %1192  ;;  %v1326_v45 = vpack.c.bf16 %v2083_v26, %v2079_v33 }
 0x4dc   : > { %2096 = vpow2.f32 %v1291_v9  ;;  %v1231_v50 = vsub.f32 %v2698_v0, %v1193_v47  ;;  %v1232_v54 = vsub.f32 %v2700_v36, %v1193_v47 }
 0x4dd   : > { %2098 = vpow2.f32 %v1293_v34  ;;  %1327 = vmatprep.subr.bf16.mxu1 %v1326_v45  ;;  %1408 = vmatprep.subr.bf16.mxu0 %v1326_v45  ;;  %v2085_v53 = vpop.eup %2084 }
 0x4de   : > { %v1279_v52 = vmul.f32 1.442695, %v1231_v50  ;;  %1328 = vmatpush1.bf16.xpose.msra.mxu1 %v1325_v51  ;;  %1409 = vmatpush1.bf16.msra.mxu0 %v1325_v51  ;;  %v1281_v10 = vmul.f32 1.442695, %v1232_v54  ;;  %v2087_v11 = vpop.eup %2086 }
 0x4df   : > { %v1196_v12 = vpop.xlane.xlu0 %1195 }
 0x4e0   : > { %v1233_v40 = vsub.f32 %v2702_v39, %v1196_v12  ;;  %v1234_v13 = vsub.f32 %v2704_v46, %v1196_v12  ;;  %2100 = vpow2.f32 %v1279_v52 }
 0x4e1   : > { %v2089_v41 = vpop.eup %2088  ;;  %2102 = vpow2.f32 %v1281_v10 }
 0x4e2   : > { %v2091_v14 = vpop.eup %2090  ;;  %v1283_v0 = vmul.f32 1.442695, %v1233_v40  ;;  %v1285_v15 = vmul.f32 1.442695, %v1234_v13  ;;  %v1323_v36 = vpack.c.bf16 %v2089_v41, %v2085_v53 }
 0x4e3   : > { %v1187_v37 = vpop.xlane.xlu0 %1186  ;;  %v1324_v38 = vpack.c.bf16 %v2091_v14, %v2087_v11 }
 0x4e4   : > { %2104 = vpow2.f32 %v1283_v0  ;;  %v1227_v62 = vsub.f32 %v2689_v29, %v1187_v37  ;;  %v1228_v61 = vsub.f32 %v2691_v30, %v1187_v37 }
 0x4e5   : > { %2106 = vpow2.f32 %v1285_v15  ;;  %1329 = vmatprep.subr.bf16.mxu1 %v1324_v38  ;;  %1410 = vmatprep.subr.bf16.mxu0 %v1324_v38  ;;  %v2093_v46 = vpop.eup %2092 }
 0x4e6   : > { %v1271_v39 = vmul.f32 1.442695, %v1227_v62  ;;  %1330 = vmatpush1.bf16.xpose.msra.mxu1 %v1323_v36  ;;  %1411 = vmatpush1.bf16.msra.mxu0 %v1323_v36  ;;  %v1273_v42 = vmul.f32 1.442695, %v1228_v61  ;;  %v2095_v32 = vpop.eup %2094 }
 0x4e7   : > { %v1190_v31 = vpop.xlane.xlu0 %1189 }
 0x4e8   : > { %v1229_v49 = vsub.f32 %v2694_v6, %v1190_v31  ;;  %v1230_v59 = vsub.f32 %v2696_v35, %v1190_v31  ;;  %2108 = vpow2.f32 %v1271_v39 }
 0x4e9   : > { %v2097_v60 = vpop.eup %2096  ;;  %2110 = vpow2.f32 %v1273_v42 }
 0x4ea   : > { %v2099_v22 = vpop.eup %2098  ;;  %v1275_v29 = vmul.f32 1.442695, %v1229_v49  ;;  %v1277_v23 = vmul.f32 1.442695, %v1230_v59  ;;  %v1321_v30 = vpack.c.bf16 %v2097_v60, %v2093_v46 }
 0x4eb   : > { %v1181_v21 = vpop.xlane.xlu0 %1180  ;;  %v1322_v17 = vpack.c.bf16 %v2099_v22, %v2095_v32 }
 0x4ec   : > { %2112 = vpow2.f32 %v1275_v29  ;;  %v1223_v20 = vsub.f32 %v2680_v1, %v1181_v21  ;;  %v1224_v55 = vsub.f32 %v2682_v2, %v1181_v21 }
 0x4ed   : > { %2114 = vpow2.f32 %v1277_v23  ;;  %1331 = vmatprep.subr.bf16.mxu1 %v1322_v17  ;;  %1412 = vmatprep.subr.bf16.mxu0 %v1322_v17  ;;  %v2101_v35 = vpop.eup %2100  ;;  %v2764_v17 = vpop.f32.mrf.mxu1 }
 0x4ee   : > { %v1263_v6 = vmul.f32 1.442695, %v1223_v20  ;;  %1332 = vmatpush1.bf16.xpose.msra.mxu1 %v1321_v30  ;;  %1413 = vmatpush1.bf16.msra.mxu0 %v1321_v30  ;;  %v1265_v56 = vmul.f32 1.442695, %v1224_v55  ;;  %v2103_v33 = vpop.eup %2102 }
 0x4ef   : > { %v1184_v19 = vpop.xlane.xlu0 %1183  ;;  %v2766_v20 = vpop.f32.mrf.mxu1 }
 0x4f0   : > { %v1225_v25 = vsub.f32 %v2685_v3, %v1184_v19  ;;  %v1226_v57 = vsub.f32 %v2687_v4, %v1184_v19  ;;  %2116 = vpow2.f32 %v1263_v6 }
 0x4f1   : > { %v2105_v58 = vpop.eup %2104  ;;  %2118 = vpow2.f32 %v1265_v56  ;;  %v2768_v55 = vpop.f32.mrf.mxu1 }
 0x4f2   : > { %v2107_v26 = vpop.eup %2106  ;;  %v1267_v1 = vmul.f32 1.442695, %v1225_v25  ;;  %v1269_v9 = vmul.f32 1.442695, %v1226_v57  ;;  %v1319_v2 = vpack.c.bf16 %v2105_v58, %v2101_v35 }
 0x4f3   : > { %v1175_v34 = vpop.xlane.xlu0 %1174  ;;  %v1320_v51 = vpack.c.bf16 %v2107_v26, %v2103_v33  ;;  %v2770_v6 = vpop.f32.mrf.mxu1 }
 0x4f4   : > { %2120 = vpow2.f32 %v1267_v1  ;;  %v1219_v47 = vsub.f32 %v2671_v28, %v1175_v34  ;;  %v1220_v45 = vsub.f32 %v2673_v7, %v1175_v34 }
 0x4f5   : > { %2122 = vpow2.f32 %v1269_v9  ;;  %1333 = vmatprep.subr.bf16.mxu1 %v1320_v51  ;;  %1414 = vmatprep.subr.bf16.mxu0 %v1320_v51  ;;  %v2109_v4 = vpop.eup %2108  ;;  %v2772_v35 = vpop.f32.mrf.mxu1 }
 0x4f6   : > { %v1255_v3 = vmul.f32 1.442695, %v1219_v47  ;;  %1334 = vmatpush1.bf16.xpose.msra.mxu1 %v1319_v2  ;;  %1415 = vmatpush1.bf16.msra.mxu0 %v1319_v2  ;;  %v1257_v50 = vmul.f32 1.442695, %v1220_v45  ;;  %v2111_v52 = vpop.eup %2110 }
 0x4f7   : > { %v1178_v54 = vpop.xlane.xlu0 %1177  ;;  %v2774_v56 = vpop.f32.mrf.mxu1 }
 0x4f8   : > { %v1221_v53 = vsub.f32 %v2676_v44, %v1178_v54  ;;  %v1222_v10 = vsub.f32 %v2678_v8, %v1178_v54  ;;  %2124 = vpow2.f32 %v1255_v3  ;;  %v2142_v3 = vld [vmem:[%s2372_s20 + $0x4] sm:$0xf] }
 0x4f9   : > { %v2113_v12 = vpop.eup %2112  ;;  %2126 = vpow2.f32 %v1257_v50  ;;  %v2776_v19 = vpop.f32.mrf.mxu1  ;;  %v2143_v50 = vld [vmem:[%s2372_s20 + $0xc] sm:$0xf] }
 0x4fa   : > { %v2115_v11 = vpop.eup %2114  ;;  %v1259_v28 = vmul.f32 1.442695, %v1221_v53  ;;  %v1261_v40 = vmul.f32 1.442695, %v1222_v10  ;;  %v1317_v7 = vpack.c.bf16 %v2113_v12, %v2109_v4  ;;  %v1368_v4 = vunpack.c.l.bf16 %v2142_v3  ;;  %v2145_v10 = vld [vmem:[%s2372_s20 + $0x1c] sm:$0xf] }
 0x4fb   : > { %v1169_v13 = vpop.xlane.xlu0 %1168  ;;  %v1318_v41 = vpack.c.bf16 %v2115_v11, %v2111_v52  ;;  %v2778_v33 = vpop.f32.mrf.mxu1  ;;  %v1369_v54 = vunpack.c.l.bf16 %v2143_v50  ;;  %v2144_v52 = vld [vmem:[%s2372_s20 + $0x14] sm:$0xf]  ;;  %v1371_v12 = vunpack.c.l.bf16 %v2145_v10 }
 0x4fc   : > { %2128 = vpow2.f32 %v1259_v28  ;;  %v1215_v14 = vsub.f32 %v2662_v16, %v1169_v13  ;;  %v1216_v0 = vsub.f32 %v2664_v63, %v1169_v13  ;;  %v1370_v53 = vunpack.c.l.bf16 %v2144_v52  ;;  %v2146_v28 = vld [vmem:[%s2372_s20 + $0x24] sm:$0xf] }
 0x4fd   : > { %2130 = vpow2.f32 %v1261_v40  ;;  %1335 = vmatprep.subr.bf16.mxu1 %v1318_v41  ;;  %1416 = vmatprep.subr.bf16.mxu0 %v1318_v41  ;;  %v2117_v8 = vpop.eup %2116  ;;  %v1372_v40 = vunpack.c.l.bf16 %v2146_v28  ;;  %v2148_v41 = vld [vmem:[%s2372_s20 + $0x34] sm:$0xf] }
 0x4fe   : > { %v1247_v44 = vmul.f32 1.442695, %v1215_v14  ;;  %1336 = vmatpush1.bf16.xpose.msra.mxu1 %v1317_v7  ;;  %1417 = vmatpush1.bf16.msra.mxu0 %v1317_v7  ;;  %v1249_v15 = vmul.f32 1.442695, %v1216_v0  ;;  %v2119_v37 = vpop.eup %2118  ;;  %v2147_v7 = vld [vmem:[%s2372_s20 + $0x2c] sm:$0xf]  ;;  %v1374_v14 = vunpack.c.l.bf16 %v2148_v41 }
 0x4ff   : > { %v1172_v36 = vpop.xlane.xlu0 %1171  ;;  %v1373_v13 = vunpack.c.l.bf16 %v2147_v7  ;;  %v2149_v0 = vld [vmem:[%s2372_s20 + $0x3c] sm:$0xf] }
 0x500   : > { %v1217_v38 = vsub.f32 %v2667_v43, %v1172_v36  ;;  %v1218_v62 = vsub.f32 %v2669_v27, %v1172_v36  ;;  %2132 = vpow2.f32 %v1247_v44  ;;  %v1375_v44 = vunpack.c.l.bf16 %v2149_v0 }
 0x501   : > { %v2121_v61 = vpop.eup %2120  ;;  %2134 = vpow2.f32 %v1249_v15 }
 0x502   : > { %v2123_v39 = vpop.eup %2122  ;;  %v1251_v16 = vmul.f32 1.442695, %v1217_v38  ;;  %v1253_v46 = vmul.f32 1.442695, %v1218_v62  ;;  %v1315_v63 = vpack.c.bf16 %v2121_v61, %v2117_v8 }
 0x503   : > { %v1316_v42 = vpack.c.bf16 %v2123_v39, %v2119_v37 }
 0x504   : > { %2136 = vpow2.f32 %v1251_v16 }
 0x505   : > { %2138 = vpow2.f32 %v1253_v46  ;;  %1337 = vmatprep.subr.bf16.mxu1 %v1316_v42  ;;  %1418 = vmatprep.subr.bf16.mxu0 %v1316_v42  ;;  %v2125_v31 = vpop.eup %2124 }
 0x506   : > { %1338 = vmatpush1.bf16.xpose.msra.mxu1 %v1315_v63  ;;  %1419 = vmatpush1.bf16.msra.mxu0 %v1315_v63  ;;  %v2127_v32 = vpop.eup %2126 }
 0x509   : > { %v2129_v49 = vpop.eup %2128 }
 0x50a   : > { %v2131_v43 = vpop.eup %2130  ;;  %v1313_v59 = vpack.c.bf16 %v2129_v49, %v2125_v31  ;;  %v1548_v49 = vld [vmem:[%s2944_s3 + $0x18] sm:$0xff] }
 0x50b   : > { %v1314_v27 = vpack.c.bf16 %v2131_v43, %v2127_v32  ;;  %v1546_v32 = vld [vmem:[%s2944_s3 + $0x8] sm:$0xff]  ;;  %v1549_v43 = vld [vmem:[%s2944_s3 + $0x20] sm:$0xff] }
 0x50c   : > { %1560 = vperm.xlu0 %1976, %v1546_v32  }
 0x50d   : > { %1339 = vmatprep.subr.bf16.mxu1 %v1314_v27  ;;  %1420 = vmatprep.subr.bf16.mxu0 %v1314_v27  ;;  %v2133_v60 = vpop.eup %2132  ;;  %v1551_v27 = vld [vmem:[%s2944_s3 + $0x30] sm:$0xff] }
 0x50e   : > { %1340 = vmatpush1.bf16.xpose.msra.mxu1 %v1313_v59  ;;  %1421 = vmatpush1.bf16.msra.mxu0 %v1313_v59  ;;  %v2135_v22 = vpop.eup %2134  ;;  %v1550_v59 = vld [vmem:[%s2944_s3 + $0x28] sm:$0xff] }
 0x511   : > { %v2137_v29 = vpop.eup %2136 }
 0x512   : > { %v2139_v23 = vpop.eup %2138  ;;  %v1311_v30 = vpack.c.bf16 %v2137_v29, %v2133_v60  ;;  %v1552_v60 = vld [vmem:[%s2944_s3 + $0x38] sm:$0xff] }
 0x513   : > { %v1312_v21 = vpack.c.bf16 %v2139_v23, %v2135_v22 }
 0x515   : > { %1341 = vmatprep.subr.bf16.mxu1 %v1312_v21  ;;  %1422 = vmatprep.subr.bf16.mxu0 %v1312_v21 }
 0x516   : > { %1342 = vmatpush1.bf16.xpose.msra.mxu1 %v1311_v30  ;;  %1423 = vmatpush1.bf16.msra.mxu0 %v1311_v30 }
 0x51d   : > { %1360 = vmatmul.mubr.bf16.vlgmr.msra.gmra.mxu1 %v2248_v5  ;;  %v2780_v5 = vpop.f32.mrf.mxu1 }
 0x51e   : > { %1658 = vmatprep.mubr.bf16.mxu1 %v2963_v48 }
 0x51f   : > { %v2782_v25 = vpop.f32.mrf.mxu1 }
 0x521   : > { %v2784_v57 = vpop.f32.mrf.mxu1 }
 0x523   : > { %v2786_v58 = vpop.f32.mrf.mxu1 }
 0x525   : > { %v2788_v26 = vpop.f32.mrf.mxu1 }
 0x527   : > { %v2790_v1 = vpop.f32.mrf.mxu1 }
 0x529   : > { %v2792_v9 = vpop.f32.mrf.mxu1 }
 0x52b   : > { %v2794_v2 = vpop.f32.mrf.mxu1 }
 0x5dd   : > { %v1361_v34 = vpop.f32.mrf.mxu1 }
 0x5de   : > { %2140 = vrcp.f32 %v1361_v34 }
 0x5df   : > { %v1363_v51 = vpop.f32.mrf.mxu1 }
 0x5e1   : > { %v1364_v47 = vpop.f32.mrf.mxu1 }
 0x5e3   : > { %v1365_v45 = vpop.f32.mrf.mxu1 }
 0x5eb   : > { %v2141_v11 = vpop.eup %2140 }
 0x5ec   : > { %v1379_v8 = vrot.slane %v2141_v11, %v841_v18  ;;  %v1547_v18 = vld [vmem:[%s2944_s3 + $0x10] sm:$0xff] }
 0x5ed   : > { %1565 = vperm.xlu1 %1975, %v1547_v18  }
 0x5ee   : > { %v1380_v15 = vmul.f32 %v1379_v8, %v1368_v4  ;;  %v1381_v36 = vmul.f32 %v1379_v8, %v1369_v54  ;;  %v1382_v37 = vmul.f32 %v1379_v8, %v1370_v53  ;;  %v1383_v38 = vmul.f32 %v1379_v8, %v1371_v12 }
 0x5ef   : > { %v1384_v62 = vmul.f32 %v1379_v8, %v1372_v40  ;;  %v1385_v61 = vmul.f32 %v1379_v8, %v1373_v13  ;;  %v1386_v39 = vmul.f32 %v1379_v8, %v1374_v14  ;;  %v1387_v16 = vmul.f32 %v1379_v8, %v1375_v44 }
 0x5f0   : > { %v1388_v46 = vpack.c.bf16 %v1381_v36, %v1380_v15  ;;  %v1389_v63 = vpack.c.bf16 %v1383_v38, %v1382_v37 }
 0x5f1   : > { %v1390_v42 = vpack.c.bf16 %v1385_v61, %v1384_v62  ;;  %v1391_v31 = vpack.c.bf16 %v1387_v16, %v1386_v39  ;;  %1570 = vperm.xlu1 %1975, %v1548_v49   ;;  %v1700_v39 = vld [vmem:[%s2372_s20 + $0x8] sm:$0xff]  ;;  %v1701_v49 = vld [vmem:[%s2372_s20 + $0x10] sm:$0xff] }
 0x5f2   : > { %1441 = vmatmul.mubr.bf16.vlgmr.msra.gmra.mxu0 %v1388_v46 }
 0x5f3   : > { %1450 = vmatprep.mubr.bf16.mxu0 %v2963_v48 }
 0x5f5   : > { %1575 = vperm.xlu1 %1975, %v1549_v43  }
 0x5f9   : > { %1580 = vperm.xlu1 %1975, %v1550_v59  }
 0x5fa   : > { %1451 = vmatmul.mubr.bf16.gmra.mxu0 %v1389_v63 }
 0x5fb   : > { %1460 = vmatprep.mubr.bf16.mxu0 %v2963_v48 }
 0x5fd   : > { %1585 = vperm.xlu1 %1975, %v1551_v27   ;;  %v1710_v27 = vunpack.c.h.bf16 %v1700_v39 }
 0x601   : > { %1590 = vperm.xlu1 %1975, %v1552_v60  }
 0x602   : > { %1461 = vmatmul.mubr.bf16.gmra.mxu0 %v1390_v42  ;;  %v1561_v42 = vpop.permute.xlu0 %1560 }
 0x603   : > { %1470 = vmatprep.mubr.bf16.mxu0 %v2963_v48 }
 0x60a   : > { %1471 = vmatmul.mubr.bf16.gmra.mxu0 %v1391_v31 }
 0x6b2   : > { %v1442_v22 = vpop.f32.mrf.mxu0 }
 0x6b3   : > { %v1481_v37 = vadd.f32 %v1442_v22, %v2764_v17  ;;  %v2008_v17 = vld [vmem:[%s2943_s2 + $0x10] sm:$0xff]  }
 0x6b4   : > { %v1444_v29 = vpop.f32.mrf.mxu0 }
 0x6b6   : > { %v1446_v23 = vpop.f32.mrf.mxu0 }
 0x6b8   : > { %v1448_v30 = vpop.f32.mrf.mxu0 }
 0x6ba   : > { %v1452_v21 = vpop.f32.mrf.mxu0 }
 0x6bb   : > { %v1485_v15 = vadd.f32 %v1452_v21, %v2772_v35  ;;  %v1556_v35 = vpop.permute.xlu1 %1555  ;;  %v1702_v21 = vld [vmem:[%s2372_s20 + $0x18] sm:$0xff] }
 0x6bc   : > { %v1454_v34 = vpop.f32.mrf.mxu0 }
 0x6be   : > { %v1456_v51 = vpop.f32.mrf.mxu0 }
 0x6bf   : > { %v1566_v38 = vpop.permute.xlu1 %1565 }
 0x6c0   : > { %v1458_v47 = vpop.f32.mrf.mxu0 }
 0x6c1   : > { %v1488_v44 = vadd.f32 %v1458_v47, %v2778_v33  ;;  %v1483_v33 = vadd.f32 %v1446_v23, %v2768_v55  ;;  %v2009_v55 = vld [vmem:[%s2943_s2 + $0x18] sm:$0xff]   ;;  %v1711_v23 = vunpack.c.l.bf16 %v1701_v49  ;;  %v1712_v47 = vunpack.c.h.bf16 %v1701_v49 }
 0x6c2   : > { %v1462_v45 = vpop.f32.mrf.mxu0 }
 0x6c3   : > { %v1571_v18 = vpop.permute.xlu1 %1570 }
 0x6c4   : > { %v1464_v3 = vpop.f32.mrf.mxu0 }
 0x6c5   : > { %v1490_v13 = vadd.f32 %v1464_v3, %v2782_v25 }
 0x6c6   : > { %v1466_v4 = vpop.f32.mrf.mxu0 }
 0x6c7   : > { %v1491_v14 = vadd.f32 %v1466_v4, %v2784_v57  ;;  %v1482_v57 = vadd.f32 %v1444_v29, %v2766_v20  ;;  %v2007_v20 = vld [vmem:[%s2943_s2 + $0x8] sm:$0xff]  }
 0x6c8   : > { %v1468_v50 = vpop.f32.mrf.mxu0 }
 0x6c9   : > { %v1492_v11 = vadd.f32 %v1468_v50, %v2786_v58  ;;  %v1486_v58 = vadd.f32 %v1454_v34, %v2774_v56  ;;  %v1537_v56 = vpack.c.bf16 %v1483_v33, %v1481_v37 }
 0x6ca   : > { %v1472_v54 = vpop.f32.mrf.mxu0 }
 0x6cb   : > { %v1493_v7 = vadd.f32 %v1472_v54, %v2788_v26  ;;  %v1542_v8 = vpack.c.bf16 %v1492_v11, %v1490_v13  ;;  %v1484_v26 = vadd.f32 %v1448_v30, %v2770_v6  ;;  %v1540_v25 = vpack.c.bf16 %v1488_v44, %v1486_v58  ;;  %v2006_v6 = vld [vmem:[%s2943_s2] sm:$0xff]  }
 0x6cc   : > { %v1474_v52 = vpop.f32.mrf.mxu0  ;;  %v1713_v54 = vunpack.c.l.bf16 %v1702_v21  ;;  %v1714_v11 = vunpack.c.h.bf16 %v1702_v21 }
 0x6cd   : > { %v1494_v28 = vadd.f32 %v1474_v52, %v2790_v1  ;;  %v1487_v1 = vadd.f32 %v1456_v51, %v2776_v19  ;;  %v1699_v19 = vld [vmem:[%s2372_s20] sm:$0xff] }
 0x6ce   : > { %v1476_v53 = vpop.f32.mrf.mxu0  ;;  %v1707_v62 = vunpack.c.l.bf16 %v1699_v19  ;;  %v1708_v46 = vunpack.c.h.bf16 %v1699_v19 }
 0x6cf   : > { %v1495_v10 = vadd.f32 %v1476_v53, %v2792_v9  ;;  %v1489_v9 = vadd.f32 %v1462_v45, %v2780_v5  ;;  %v1539_v36 = vpack.c.bf16 %v1487_v1, %v1485_v15  ;;  %v1538_v5 = vpack.c.bf16 %v1484_v26, %v1482_v57  ;;  %v1576_v45 = vpop.permute.xlu1 %1575  ;;  %v1703_v53 = vld [vmem:[%s2372_s20 + $0x20] sm:$0xff]  ;;  %v1705_v15 = vld [vmem:[%s2372_s20 + $0x30] sm:$0xff] }
 0x6d0   : > { %v1478_v12 = vpop.f32.mrf.mxu0  ;;  %v1715_v13 = vunpack.c.l.bf16 %v1703_v53 }
 0x6d1   : > { %v1496_v40 = vadd.f32 %v1478_v12, %v2794_v2  ;;  %v1543_v0 = vpack.c.bf16 %v1495_v10, %v1493_v7  ;;  %v1541_v2 = vpack.c.bf16 %v1491_v14, %v1489_v9  ;;  %v1716_v9 = vunpack.c.h.bf16 %v1703_v53 }
 0x6d3   : > { %v1544_v41 = vpack.c.bf16 %v1496_v40, %v1494_v28 }
 0x6d5   : > { %1634 = vmatprep.subr.bf16.mxu1 %v1544_v41  ;;  %v1581_v41 = vpop.permute.xlu1 %1580 }
 0x6d6   : > { %1635 = vmatpush1.bf16.msra.mxu1 %v1543_v0  ;;  %v1704_v0 = vld [vmem:[%s2372_s20 + $0x28] sm:$0xff] }
 0x6d7   : > { %1636 = vmatprep.subr.bf16.mxu1 %v1542_v8  ;;  %v1717_v26 = vunpack.c.l.bf16 %v1704_v0 }
 0x6da   : > { %1637 = vmatpush1.bf16.msra.mxu1 %v1541_v2 }
 0x6db   : > { %1638 = vmatprep.subr.bf16.mxu1 %v1540_v25 }
 0x6de   : > { %1639 = vmatpush1.bf16.msra.mxu1 %v1539_v36  ;;  %v1718_v36 = vunpack.c.h.bf16 %v1704_v0 }
 0x6df   : > { %1640 = vmatprep.subr.bf16.mxu1 %v1538_v5  ;;  %v1586_v5 = vpop.permute.xlu1 %1585 }
 0x6e2   : > { %1641 = vmatpush1.bf16.msra.mxu1 %v1537_v56 }
 0x6e5   : > { %1910 = vmatmul.mubr.msk.bf16.vlgmr.msra.gmra.mxu1 %vm1613_vm2, %v2006_v6 }
 0x6e6   : > { %1668 = vmatprep.mubr.bf16.mxu1 %v2963_v48 }
 0x6ed   : > { %1911 = vmatmul.mubr.msk.bf16.gmra.mxu1 %vm1613_vm2, %v2007_v20  ;;  %v1719_v20 = vunpack.c.l.bf16 %v1705_v15 }
 0x6ee   : > { %1678 = vmatprep.mubr.bf16.mxu1 %v2963_v48 }
 0x6f5   : > { %1912 = vmatmul.mubr.msk.bf16.gmra.mxu1 %vm1613_vm2, %v2008_v17 }
 0x6f6   : > { %1688 = vmatprep.mubr.bf16.mxu1 %v2963_v48  ;;  %v1709_v48 = vunpack.c.l.bf16 %v1700_v39 }
 0x6fd   : > { %1913 = vmatmul.mubr.msk.bf16.gmra.mxu1 %vm1613_vm2, %v2009_v55  ;;  %v1706_v55 = vld [vmem:[%s2372_s20 + $0x38] sm:$0xff]  ;;  %s1919_s20 = sshll.u32 %s2298_s19, 11  ;;  %s2178_s19 = scalar_lea.vmem %s2896_s23, 2048 }
 0x6fe   : > { %s2894_s30 = scalar_lea.hbm %s2945_s4, %s1919_s20  ;;  %p2179_p11 = scmp.ne.s32.totalorder %s2896_s23, %s2178_s19 }
 0x6ff   : > { %p2186_p7 = scmp.lt.s32.totalorder %s2184_s13, %s2178_s19 }
 0x700   : > { %p2180_p13 = pnand %p2179_p11, %p2968_p12 }
 0x701   : > { %p2187_p8 = por %p2186_p7, %p2185_p5 }
 0x702   : > { %p2181_p4 = pneg %p2180_p13 }
 0x704   : > { %p2188_p10 = pnand %p2187_p8, %p2181_p4 }
 0x7a5   : > { %v1660_v61 = vpop.f32.mrf.mxu1 }
 0x7a6   : > { %v1661_v16 = vadd.f32 %v1660_v61, %v1556_v35 }
 0x7a7   : > { %v1662_v63 = vpop.f32.mrf.mxu1 }
 0x7a8   : > { %v1723_v31 = vadd.f32 %v1707_v62, %v1661_v16  ;;  %v1663_v24 = vadd.f32 %v1662_v63, %v1556_v35  ;;  %v1721_v16 = vunpack.c.l.bf16 %v1706_v55 }
 0x7a9   : > { %v1664_v32 = vpop.f32.mrf.mxu1 }
 0x7aa   : > { %1739 = vst [vmem:[%s2868_s22] sm:$0xff] %v1723_v31  ;;  %v1724_v43 = vadd.f32 %v1708_v46, %v1663_v24  ;;  %v1665_v59 = vadd.f32 %v1664_v32, %v1561_v42  ;;  %v1591_v46 = vpop.permute.xlu1 %1590  ;;  %v1722_v24 = vunpack.c.h.bf16 %v1706_v55 }
 0x7ab   : > { %v1666_v60 = vpop.f32.mrf.mxu1 }
 0x7ac   : > { %1740 = vst [vmem:[%s2868_s22 + $0x8] sm:$0xff] %v1724_v43  ;;  %v1725_v22 = vadd.f32 %v1709_v48, %v1665_v59  ;;  %v1667_v29 = vadd.f32 %v1666_v60, %v1561_v42 }
 0x7ad   : > { %v1670_v30 = vpop.f32.mrf.mxu1 }
 0x7ae   : > { %1741 = vst [vmem:[%s2868_s22 + $0x10] sm:$0xff] %v1725_v22  ;;  %v1726_v34 = vadd.f32 %v1710_v27, %v1667_v29  ;;  %v1671_v51 = vadd.f32 %v1670_v30, %v1566_v38 }
 0x7af   : > { %v1672_v3 = vpop.f32.mrf.mxu1 }
 0x7b0   : > { %1742 = vst [vmem:[%s2868_s22 + $0x18] sm:$0xff] %v1726_v34  ;;  %v1727_v4 = vadd.f32 %v1711_v23, %v1671_v51  ;;  %v1673_v50 = vadd.f32 %v1672_v3, %v1566_v38  ;;  %v1720_v38 = vunpack.c.h.bf16 %v1705_v15 }
 0x7b1   : > { %v1674_v52 = vpop.f32.mrf.mxu1 }
 0x7b2   : > { %1743 = vst [vmem:[%s2868_s22 + $0x20] sm:$0xff] %v1727_v4  ;;  %v1728_v10 = vadd.f32 %v1712_v47, %v1673_v50  ;;  %v1675_v12 = vadd.f32 %v1674_v52, %v1571_v18 }
 0x7b3   : > { %v1676_v28 = vpop.f32.mrf.mxu1 }
 0x7b4   : > { %1744 = vst [vmem:[%s2868_s22 + $0x28] sm:$0xff] %v1728_v10  ;;  %v1729_v40 = vadd.f32 %v1713_v54, %v1675_v12  ;;  %v1677_v7 = vadd.f32 %v1676_v28, %v1571_v18 }
 0x7b5   : > { %v1680_v14 = vpop.f32.mrf.mxu1 }
 0x7b6   : > { %1745 = vst [vmem:[%s2868_s22 + $0x30] sm:$0xff] %v1729_v40  ;;  %v1730_v44 = vadd.f32 %v1714_v11, %v1677_v7  ;;  %v1681_v8 = vadd.f32 %v1680_v14, %v1576_v45 }
 0x7b7   : > { %v1682_v58 = vpop.f32.mrf.mxu1 }
 0x7b8   : > { %1746 = vst [vmem:[%s2868_s22 + $0x38] sm:$0xff] %v1730_v44  ;;  %v1731_v1 = vadd.f32 %v1715_v13, %v1681_v8  ;;  %v1683_v2 = vadd.f32 %v1682_v58, %v1576_v45 }
 0x7b9   : > { %v1684_v25 = vpop.f32.mrf.mxu1 }
 0x7ba   : > { %1747 = vst [vmem:[%s2868_s22 + $0x40] sm:$0xff] %v1731_v1  ;;  %v1732_v57 = vadd.f32 %v1716_v9, %v1683_v2  ;;  %v1685_v33 = vadd.f32 %v1684_v25, %v1581_v41 }
 0x7bb   : > { %v1686_v37 = vpop.f32.mrf.mxu1 }
 0x7bc   : > { %1748 = vst [vmem:[%s2868_s22 + $0x48] sm:$0xff] %v1732_v57  ;;  %v1733_v56 = vadd.f32 %v1717_v26, %v1685_v33  ;;  %v1687_v6 = vadd.f32 %v1686_v37, %v1581_v41 }
 0x7bd   : > { %v1690_v17 = vpop.f32.mrf.mxu1 }
 0x7be   : > { %1749 = vst [vmem:[%s2868_s22 + $0x50] sm:$0xff] %v1733_v56  ;;  %v1734_v35 = vadd.f32 %v1718_v36, %v1687_v6  ;;  %v1691_v19 = vadd.f32 %v1690_v17, %v1586_v5 }
 0x7bf   : > { %v1692_v62 = vpop.f32.mrf.mxu1 }
 0x7c0   : > { %1750 = vst [vmem:[%s2868_s22 + $0x58] sm:$0xff] %v1734_v35  ;;  %v1735_v61 = vadd.f32 %v1719_v20, %v1691_v19  ;;  %v1693_v39 = vadd.f32 %v1692_v62, %v1586_v5 }
 0x7c1   : > { %v1694_v63 = vpop.f32.mrf.mxu1 }
 0x7c2   : > { %1751 = vst [vmem:[%s2868_s22 + $0x60] sm:$0xff] %v1735_v61  ;;  %v1736_v42 = vadd.f32 %v1720_v38, %v1693_v39  ;;  %v1695_v31 = vadd.f32 %v1694_v63, %v1591_v46 }
 0x7c3   : > { %v1696_v48 = vpop.f32.mrf.mxu1 }
 0x7c4   : > { %1752 = vst [vmem:[%s2868_s22 + $0x68] sm:$0xff] %v1736_v42  ;;  %v1737_v18 = vadd.f32 %v1721_v16, %v1695_v31  ;;  %v1697_v32 = vadd.f32 %v1696_v48, %v1591_v46 }
 0x7c6   : > { %1753 = vst [vmem:[%s2868_s22 + $0x70] sm:$0xff] %v1737_v18  ;;  %v1738_v49 = vadd.f32 %v1722_v24, %v1697_v32 }
 0x7c8   : > { %1754 = vst [vmem:[%s2868_s22 + $0x78] sm:$0xff] %v1738_v49 }
 0x7c9   : > { %2191 = shalt.err (!%p2188_p10)
}
 0x7ca   : > { %s2192_s14 = scalar_lea.hbm %s2894_s30, 2048  ;;  %s2196_s8 = scalar_lea.hbm %s2945_s4, 4096 }
 0x7cb   : > { %p2193_p0 = scmp.ne.s32.totalorder %s2894_s30, %s2192_s14  ;;  %p2197_p1 = scmp.lt.s32.totalorder %s2894_s30, %s2945_s4 }
 0x7cc   : > { %p2198_p3 = scmp.lt.s32.totalorder %s2196_s8, %s2192_s14 }
 0x7cd   : > { %p2194_p2 = pnand %p2193_p0, %p2968_p12 }
 0x7ce   : > { %p2199_p6 = por %p2198_p3, %p2197_p1 }
 0x7cf   : > { %p2195_p9 = pneg %p2194_p2 }
 0x7d1   : > { %p2200_p11 = pnand %p2199_p6, %p2195_p9 }
 0x7d3   : > { %2203 = shalt.err (!%p2200_p11)
}
 0x7d4   : > { %s2250_s22 = smov 256   ;;  %s2251_s20 = smov 16  }
 0x7d5   : > { %1925 = dma.vmem_to_hbm [thread:$0]  (%p2968_p12), %s2896_s23, 2048, %s2894_s30, %s1756_s5, %s2250_s22, %s2250_s22, %s2251_s20  }
 0x7d6 PF: > { %s1784_s28 = sand.u32 1, %s2230_s15   ;;  %p2969_p13 = scmp.ne.s32.totalorder %s2956_s27, 0 }
 0x7d7   : > { %p2970_p4 = scmp.ge.s32.totalorder %s2242_s18, 2  ;;  %s1785_s29 = scalar_lea.sflag [#allocation5], %s1784_s28 }
 0x7d9   : > { %p1932_p5 = pnand %p2970_p4, %p2969_p13 }
 0x7db   : > { %p1933_p7 = pneg %p1932_p5 }
 0x7dd   : > { %2225 = dma.done.wait (%p1933_p7), %s1785_s29, 2048  }
 0x7de   : > { %2227 = vsyncadd (%p1933_p7), %s1785_s29, 4294965248  ;;  %p17_p8 = scmp.ge.s32.totalorder %s2302_s21, 4   ;;  %s2971_s15 = smov %s2234_s16 }
 0x7df   : > { %s2972_s16 = smov %s2238_s17  ;;  %s2973_s17 = smov %s2314_s24 }
 0x7e0   : > { %s2974_s18 = smov %s2302_s21  ;;  %19 = sbr.rel (!%p17_p8) target bundleno = 5 (0x5), region = 82 }
 0x7e5   :  { %1790 = vsyncpa [#allocation4], 1 }
 0x7e6   :  { %1792 = vsyncpa [#allocation4 + $0x1], 1 }
 0x7e7   :  { %1793 = vsyncpa [#allocation5], 1 }
 0x7e8   :  { %1795 = vsyncpa [#allocation5 + $0x1], 1 }

</bundles_post_ra>
